<compile_context>
chip_gen: v6e
topology: v6e:2x2x1
jax: 0.10.0
libtpu: 0.0.40
codegen_flags: <defaults>
</compile_context>

<pallas_src>
import functools

import jax
import jax.numpy as jnp
from jax import lax
from jax.experimental import pallas as pl
from jax.experimental.pallas import tpu as pltpu

OUTPUT_DIM = 2048  # the module raises unless output_dim == 2048
LAYER_CFG = [(64, 3, 1), (128, 4, 2), (256, 23, 2), (512, 3, 2)]  # resnet101


def _round_up(x, m):
    return ((x + m - 1) // m) * m


def _has_big_mxu():
    """v6e / v7x have a 256x256 MXU -> prefer tm=256; v5e and older keep tm=128."""
    try:
        kind = jax.devices()[0].device_kind.lower()
    except Exception:
        return False
    return ("v6" in kind) or ("v7" in kind) or ("tpu7" in kind)


_BIG_MXU = _has_big_mxu()


# ----------------------------------------------------------------------------
# Pallas GEMM kernels (MXU).
# ----------------------------------------------------------------------------
def _mm_stats_kernel(a_ref, b_ref, o_ref, stats_ref, acc_ref):
    """out = bf16(A @ B); epilogue emits per-column sum / sum-of-squares (for BN)."""
    k = pl.program_id(2)

    @pl.when(k == 0)
    def _():
        acc_ref[...] = jnp.zeros_like(acc_ref)
        stats_ref[...] = jnp.zeros_like(stats_ref)

    acc_ref[...] += jnp.dot(a_ref[...], b_ref[...],
                            preferred_element_type=jnp.float32)

    @pl.when(k == pl.num_programs(2) - 1)
    def _():
        y = acc_ref[...]
        o_ref[...] = y.astype(o_ref.dtype)
        stats_ref[0:1, :] = jnp.sum(y, axis=0, keepdims=True)
        stats_ref[1:2, :] = jnp.sum(y * y, axis=0, keepdims=True)


def _mm_bias_kernel(a_ref, b_ref, bias_ref, o_ref, *, relu):
    """out = A @ B + bias (optionally ReLU), f32 output (head GEMMs only)."""
    k = pl.program_id(2)

    @pl.when(k == 0)
    def _():
        o_ref[...] = jnp.zeros_like(o_ref)

    o_ref[...] += jnp.dot(a_ref[...], b_ref[...],
                          preferred_element_type=jnp.float32)

    @pl.when(k == pl.num_programs(2) - 1)
    def _():
        y = o_ref[...] + bias_ref[...]
        if relu:
            y = jnp.maximum(y, 0.0)
        o_ref[...] = y


def _gemm_tiles(M, K, N):
    """Lane-dense N tiles (>=128), fat K tiles, tm matched to the MXU row count."""
    if _BIG_MXU and M >= 256:
        tm = 256
    elif M >= 128:
        tm = 128
    else:
        tm = _round_up(M, 8)
    Mp = _round_up(M, tm)
    Kp = _round_up(K, 128)
    if Kp <= 512:
        tk = Kp
    else:
        tk = 128
        for cand in (512, 384, 256):          # multiples of 128 only (lane dim of A)
            if Kp % cand == 0:
                tk = cand
                break
    Np = _round_up(N, 128)                    # always lane-dense output blocks
    tn = 512 if Np % 512 == 0 else (256 if Np % 256 == 0 else 128)
    return tm, tk, tn, Mp, Kp, Np


def _pad_operands(a, b, M, K, N, Mp, Kp, Np):
    a = a.astype(jnp.bfloat16)                # no-op for already-bf16 activations
    b = b.astype(jnp.bfloat16)                # no-op: weights stored bf16 at init
    if (Mp, Kp) != (M, K):
        a = jnp.pad(a, ((0, Mp - M), (0, Kp - K)))
    if (Kp, Np) != (K, N):
        b = jnp.pad(b, ((0, Kp - K), (0, Np - N)))
    return a, b


def pallas_gemm_stats(a, b):
    """(M,K)@(K,N) -> padded bf16 (Mp,Np) out plus per-column sum / sum-of-squares.

    Padded A rows / B columns are exact zeros, so BN statistics (divided by the true
    M and sliced to the true N) stay correct.
    """
    M, K = a.shape
    _, N = b.shape
    tm, tk, tn, Mp, Kp, Np = _gemm_tiles(M, K, N)
    a, b = _pad_operands(a, b, M, K, N, Mp, Kp, Np)
    mt, nt, kt = Mp // tm, Np // tn, Kp // tk
    out, stats = pl.pallas_call(
        _mm_stats_kernel,
        out_shape=(jax.ShapeDtypeStruct((Mp, Np), jnp.bfloat16),
                   jax.ShapeDtypeStruct((mt * 8, Np), jnp.float32)),
        grid_spec=pltpu.PrefetchScalarGridSpec(
            num_scalar_prefetch=0,
            grid=(mt, nt, kt),
            in_specs=[pl.BlockSpec((tm, tk), lambda i, j, k: (i, k)),
                      pl.BlockSpec((tk, tn), lambda i, j, k: (k, j))],
            out_specs=[pl.BlockSpec((tm, tn), lambda i, j, k: (i, j)),
                       pl.BlockSpec((8, tn), lambda i, j, k: (i, j))],
            scratch_shapes=[pltpu.VMEM((tm, tn), jnp.float32)]),
        compiler_params=pltpu.CompilerParams(
            dimension_semantics=("parallel", "parallel", "arbitrary")),
    )(a, b)
    stats = stats.reshape(mt, 8, Np)
    col_sum = jnp.sum(stats[:, 0, :N], axis=0)
    col_sq = jnp.sum(stats[:, 1, :N], axis=0)
    return out, col_sum, col_sq


def pallas_gemm_bias(a, b, bias, relu=False):
    """(M,K)@(K,N) + bias (optional ReLU), bias fused into the GEMM epilogue."""
    M, K = a.shape
    _, N = b.shape
    tm, tk, tn, Mp, Kp, Np = _gemm_tiles(M, K, N)
    a, b = _pad_operands(a, b, M, K, N, Mp, Kp, Np)
    bias2 = bias.astype(jnp.float32).reshape(1, N)
    if Np != N:
        bias2 = jnp.pad(bias2, ((0, 0), (0, Np - N)))
    mt, nt, kt = Mp // tm, Np // tn, Kp // tk
    out = pl.pallas_call(
        functools.partial(_mm_bias_kernel, relu=relu),
        out_shape=jax.ShapeDtypeStruct((Mp, Np), jnp.float32),
        grid_spec=pltpu.PrefetchScalarGridSpec(
            num_scalar_prefetch=0,
            grid=(mt, nt, kt),
            in_specs=[pl.BlockSpec((tm, tk), lambda i, j, k: (i, k)),
                      pl.BlockSpec((tk, tn), lambda i, j, k: (k, j)),
                      pl.BlockSpec((1, tn), lambda i, j, k: (0, j))],
            out_specs=pl.BlockSpec((tm, tn), lambda i, j, k: (i, j))),
        compiler_params=pltpu.CompilerParams(
            dimension_semantics=("parallel", "parallel", "arbitrary")),
    )(a, b, bias2)
    if (Mp, Np) != (M, N):
        out = out[:M, :N]
    return out


# ----------------------------------------------------------------------------
# Gridded elementwise Pallas kernels (VPU): BN affine(+ReLU) and affine+add+ReLU.
# Inputs are the padded bf16 GEMM outputs (lane-dense); outputs are bf16.
# ----------------------------------------------------------------------------
def _affine_kernel(x_ref, s_ref, t_ref, o_ref, *, relu):
    y = x_ref[...].astype(jnp.float32) * s_ref[...] + t_ref[...]
    if relu:
        y = jnp.maximum(y, 0.0)
    o_ref[...] = y.astype(o_ref.dtype)


def _affine_add_relu_kernel(x_ref, s_ref, t_ref, r_ref, o_ref):
    y = (x_ref[...].astype(jnp.float32) * s_ref[...] + t_ref[...]
         + r_ref[...].astype(jnp.float32))
    o_ref[...] = jnp.maximum(y, 0.0).astype(o_ref.dtype)


def _affine_rows(Mp, C):
    """Row block: ~1 MiB, multiple of 16 (bf16 sublane pack), >=2 grid blocks when
    possible (so v7x's second TensorCore is not idle)."""
    if Mp % 16 != 0:
        return Mp                                  # tiny M: one full-extent block
    budget = max(16, ((1 << 20) // (4 * C)) // 16 * 16)
    budget = min(budget, 1024, Mp)
    if Mp >= 32:
        budget = min(budget, max(16, (Mp // 2) // 16 * 16))
    r = budget
    while r >= 16:
        if Mp % r == 0:
            return r
        r -= 16
    return Mp


def _channel_params(scale, shift, Np):
    C = scale.shape[0]
    s = scale.astype(jnp.float32).reshape(1, C)
    t = shift.astype(jnp.float32).reshape(1, C)
    if Np != C:
        s = jnp.pad(s, ((0, 0), (0, Np - C)))
        t = jnp.pad(t, ((0, 0), (0, Np - C)))
    return s, t


def pallas_affine(x2, scale, shift, relu=False):
    Mp, Np = x2.shape
    s, t = _channel_params(scale, shift, Np)
    rows = _affine_rows(Mp, Np)
    return pl.pallas_call(
        functools.partial(_affine_kernel, relu=relu),
        out_shape=jax.ShapeDtypeStruct((Mp, Np), jnp.bfloat16),
        grid=(Mp // rows,),
        in_specs=[pl.BlockSpec((rows, Np), lambda i: (i, 0)),
                  pl.BlockSpec((1, Np), lambda i: (0, 0)),
                  pl.BlockSpec((1, Np), lambda i: (0, 0))],
        out_specs=pl.BlockSpec((rows, Np), lambda i: (i, 0)),
        compiler_params=pltpu.CompilerParams(dimension_semantics=("parallel",)),
    )(x2, s, t)


def pallas_affine_add_relu(x2, scale, shift, residual2):
    Mp, Np = x2.shape
    M, C = residual2.shape
    s, t = _channel_params(scale, shift, Np)
    residual2 = residual2.astype(jnp.bfloat16)
    if (M, C) != (Mp, Np):
        residual2 = jnp.pad(residual2, ((0, Mp - M), (0, Np - C)))
    rows = _affine_rows(Mp, Np)
    return pl.pallas_call(
        _affine_add_relu_kernel,
        out_shape=jax.ShapeDtypeStruct((Mp, Np), jnp.bfloat16),
        grid=(Mp // rows,),
        in_specs=[pl.BlockSpec((rows, Np), lambda i: (i, 0)),
                  pl.BlockSpec((1, Np), lambda i: (0, 0)),
                  pl.BlockSpec((1, Np), lambda i: (0, 0)),
                  pl.BlockSpec((rows, Np), lambda i: (i, 0))],
        out_specs=pl.BlockSpec((rows, Np), lambda i: (i, 0)),
        compiler_params=pltpu.CompilerParams(dimension_semantics=("parallel",)),
    )(x2, s, t, residual2)


# ----------------------------------------------------------------------------
# NN building blocks (glue in JAX inside jit, heavy compute in Pallas)
# ----------------------------------------------------------------------------
def _im2col(x, kh, kw, stride, padding):
    """NHWC -> (N*Ho*Wo, kh*kw*Cin) bf16 patches."""
    N, H, W, Cin = x.shape
    Ho = (H + 2 * padding - kh) // stride + 1
    Wo = (W + 2 * padding - kw) // stride + 1
    if x.dtype != jnp.bfloat16:
        x = x.astype(jnp.bfloat16)          # only hits the f32 network inputs
    if padding:
        x = jnp.pad(x, ((0, 0), (padding, padding), (padding, padding), (0, 0)))
    if kh == 1 and kw == 1:
        if stride != 1:
            x = x[:, ::stride, ::stride, :]
        a = x.reshape(N * Ho * Wo, Cin)
    else:
        # TODO(synk): shifted BlockSpec index maps / halo DMA instead of materializing.
        cols = []
        for i in range(kh):
            for j in range(kw):
                cols.append(x[:, i:i + (Ho - 1) * stride + 1:stride,
                              j:j + (Wo - 1) * stride + 1:stride, :])
        a = jnp.stack(cols, axis=3).reshape(N * Ho * Wo, kh * kw * Cin)
    return a, (N, Ho, Wo)


def conv_bn(x, w, gamma, beta, *, stride=1, padding=0, relu=False,
            residual=None, eps=1e-5):
    """Conv (no bias) + training-mode BatchNorm (+ optional ReLU / residual-add+ReLU).

    Batch statistics come from the GEMM kernel's epilogue (no extra HBM pass);
    normalization (+ReLU, +residual) is a single gridded elementwise pass emitting bf16.
    """
    kh, kw, Cin, Cout = w.shape
    a, (N, Ho, Wo) = _im2col(x, kh, kw, stride, padding)
    M = a.shape[0]
    wmat = w.reshape(kh * kw * Cin, Cout)
    y2, ssum, ssq = pallas_gemm_stats(a, wmat)      # y2: (Mp, Np) bf16, padded
    mean = ssum / M
    var = jnp.maximum(ssq / M - mean * mean, 0.0)   # biased var, clamped >= 0
    scale = gamma * lax.rsqrt(var + eps)
    shift = beta - mean * scale
    if residual is not None:
        out2 = pallas_affine_add_relu(y2, scale, shift, residual.reshape(M, Cout))
    else:
        out2 = pallas_affine(y2, scale, shift, relu=relu)
    out2 = out2[:M, :Cout]                           # no-op when already exact
    return out2.reshape(N, Ho, Wo, Cout)


def maxpool_3x3_s2_p1(x):
    """MaxPool2d(3, stride=2, padding=1); pairwise max tree, no (9,M,C) tensor."""
    N, H, W, C = x.shape
    Ho = (H + 2 - 3) // 2 + 1
    Wo = (W + 2 - 3) // 2 + 1
    xp = jnp.pad(x, ((0, 0), (1, 1), (1, 1), (0, 0)),
                 constant_values=float("-inf"))
    out = None
    for i in range(3):
        for j in range(3):
            c = xp[:, i:i + 2 * (Ho - 1) + 1:2, j:j + 2 * (Wo - 1) + 1:2, :]
            out = c if out is None else jnp.maximum(out, c)
    return out


@jax.jit
def _stem_forward(x_nchw, w, gamma, beta):
    """7x7 s2 p3 conv (no bias) -> bn1 -> ReLU -> maxpool 3x3 s2 p1."""
    x = jnp.transpose(x_nchw.astype(jnp.float32), (0, 2, 3, 1))
    h = conv_bn(x, w, gamma, beta, stride=2, padding=3, relu=True)
    return maxpool_3x3_s2_p1(h)


@functools.partial(jax.jit, static_argnames=("stride", "has_down"))
def _bottleneck_forward(x, blk, *, stride, has_down):
    identity = x
    out = conv_bn(x, blk["conv1_w"], blk["bn1"][0], blk["bn1"][1],
                  stride=1, padding=0, relu=True)
    out = conv_bn(out, blk["conv2_w"], blk["bn2"][0], blk["bn2"][1],
                  stride=stride, padding=1, relu=True)
    if has_down:
        identity = conv_bn(x, blk["down_w"], blk["down_bn"][0], blk["down_bn"][1],
                           stride=stride, padding=0, relu=False)
    # bn3 + residual add + ReLU fused into one elementwise pass.
    return conv_bn(out, blk["conv3_w"], blk["bn3"][0], blk["bn3"][1],
                   stride=1, padding=0, residual=identity)


@jax.jit
def _head_forward(xr, xd, fusion_w, fusion_b, fc_w, fc_b):
    """concat -> ReLU -> 1x1 conv(+bias)+ReLU -> AdaptiveMaxPool2d(1) -> ReLU -> FC."""
    x = jnp.maximum(jnp.concatenate([xr, xd], axis=-1), 0.0)
    N, H, W, C = x.shape
    y = pallas_gemm_bias(x.reshape(N * H * W, C), fusion_w, fusion_b, relu=True)
    y = y.reshape(N, H, W, -1)
    pooled = jnp.maximum(jnp.max(y, axis=(1, 2)), 0.0)
    return pallas_gemm_bias(pooled, fc_w, fc_b, relu=False)


def resnet101_forward(params, x):
    """Mirrors ResNet101.forward((x_rgb, x_depth)) -> (N, 2048)."""
    x_rgb, x_depth = x
    bn1_g, bn1_b = params["resnet"]["bn1"]

    def branch(inp_nchw, stem_w):
        h = _stem_forward(inp_nchw, stem_w, bn1_g, bn1_b)
        for li, (_, nblocks, stride) in enumerate(LAYER_CFG):
            for bi in range(nblocks):
                h = _bottleneck_forward(
                    h, params["resnet"]["layers"][li][bi],
                    stride=(stride if bi == 0 else 1), has_down=(bi == 0))
        return h

    # Trunk weights are shared; the two passes stay separate so that training-mode
    # BatchNorm statistics remain per-modality (matches two PyTorch forward calls).
    xr = branch(x_rgb, params["rgb_conv_w"])
    xd = branch(x_depth, params["depth_conv_w"])
    return _head_forward(xr, xd, params["fusion_conv_w"], params["fusion_conv_b"],
                         params["fc_w"], params["fc_b"])


# ----------------------------------------------------------------------------
# Deterministic parameter construction (shapes from the PyTorch __init__).
# Conv / FC weights are stored ONCE in bf16 GEMM-friendly layout (kh,kw,Cin,Cout) /
# (in,out); BN affine params and biases stay f32.
# ----------------------------------------------------------------------------
class _Keys:
    def __init__(self, seed):
        self._key = jax.random.PRNGKey(seed)

    def __call__(self):
        self._key, sub = jax.random.split(self._key)
        return sub


def _kaiming(key, shape, fan_in, dtype=jnp.bfloat16):
    w = jnp.sqrt(2.0 / fan_in) * jax.random.normal(key, shape, jnp.float32)
    return w.astype(dtype)


def _bn_params(c):
    return (jnp.ones((c,), jnp.float32), jnp.zeros((c,), jnp.float32))


def init_params():
    kg = _Keys(0)
    params = {
        "rgb_conv_w": _kaiming(kg(), (7, 7, 3, 64), 3 * 49),
        "depth_conv_w": _kaiming(kg(), (7, 7, 1, 64), 1 * 49),
    }
    resnet = {"bn1": _bn_params(64)}
    inplanes = 64
    layers = []
    for planes, nblocks, _ in LAYER_CFG:
        blocks = []
        for b in range(nblocks):
            outp = planes * 4
            blk = {
                "conv1_w": _kaiming(kg(), (1, 1, inplanes, planes), inplanes),
                "bn1": _bn_params(planes),
                "conv2_w": _kaiming(kg(), (3, 3, planes, planes), planes * 9),
                "bn2": _bn_params(planes),
                "conv3_w": _kaiming(kg(), (1, 1, planes, outp), planes),
                "bn3": _bn_params(outp),
            }
            if b == 0:  # torchvision: downsample on the first block of every layer
                blk["down_w"] = _kaiming(kg(), (1, 1, inplanes, outp), inplanes)
                blk["down_bn"] = _bn_params(outp)
            blocks.append(blk)
            inplanes = outp
        layers.append(blocks)
    resnet["layers"] = layers
    params["resnet"] = resnet
    params["fusion_conv_w"] = _kaiming(kg(), (4096, 2048), 4096)
    params["fusion_conv_b"] = jnp.zeros((2048,), jnp.float32)
    params["fc_w"] = _kaiming(kg(), (2048, OUTPUT_DIM), 2048)
    params["fc_b"] = jnp.zeros((OUTPUT_DIM,), jnp.float32)
    return params


# ----------------------------------------------------------------------------
if __name__ == "__main__":
    params = init_params()

    key = jax.random.PRNGKey(0)
    k_rgb, k_depth = jax.random.split(key)
    # small but stride-compatible shapes: batch=2, 64x64 spatial
    x_rgb = jax.random.normal(k_rgb, (2, 3, 64, 64), jnp.float32)
    x_depth = jax.random.normal(k_depth, (2, 1, 64, 64), jnp.float32)

    out = resnet101_forward(params, (x_rgb, x_depth))
    out = jax.block_until_ready(out)

    assert out.shape == (2, OUTPUT_DIM), out.shape
    assert out.dtype == jnp.float32
    assert bool(jnp.all(jnp.isfinite(out)))
    print("KERNEL_OK")
</pallas_src>

<mosaic_0001>
module attributes {stable_mosaic.version = 11 : i64} {
  func.func @_mm_stats_kernel(%arg0: i32, %arg1: i32, %arg2: i32, %arg3: memref<128x256xbf16, #tpu.memory_space<vmem>>, %arg4: memref<256x128xbf16, #tpu.memory_space<vmem>>, %arg5: memref<128x128xbf16, #tpu.memory_space<vmem>>, %arg6: memref<8x128xf32, #tpu.memory_space<vmem>>, %arg7: memref<128x128xf32, #tpu.memory_space<vmem>>) attributes {dimension_semantics = [#tpu.dimension_semantics<parallel>, #tpu.dimension_semantics<parallel>, #tpu.dimension_semantics<arbitrary>], iteration_bounds = array<i64: 16, 1, 1>, scalar_prefetch = 0 : i64, scratch_operands = 1 : i64, tpu.core_type = #tpu.core_type<tc>, window_params = [{transform_indices = @transform_0, window_bounds = array<i64: 128, 256>}, {transform_indices = @transform_1, window_bounds = array<i64: 256, 128>}, {transform_indices = @transform_2, window_bounds = array<i64: 128, 128>}, {transform_indices = @transform_3, window_bounds = array<i64: 8, 128>}]} {
    %c0_i32 = arith.constant 0 : i32
    %0 = arith.cmpi eq, %arg2, %c0_i32 : i32
    %1 = arith.extui %0 : i1 to i32
    %c0_i32_0 = arith.constant 0 : i32
    %2 = arith.cmpi ne, %1, %c0_i32_0 : i32
    scf.if %2 {
      %cst_10 = arith.constant 0.000000e+00 : f32
      %12 = vector.broadcast %cst_10 : f32 to vector<128x128xf32>
      %c0_11 = arith.constant 0 : index
      %c0_12 = arith.constant 0 : index
      %13 = vector.load %arg7[%c0_11, %c0_12] : memref<128x128xf32, #tpu.memory_space<vmem>>, vector<128x128xf32>
      tpu.vector_store %arg7[%c0_11, %c0_12], %12 {strides = array<i32>} : memref<128x128xf32, #tpu.memory_space<vmem>>, vector<128x128xf32>,
      %cst_13 = arith.constant 0.000000e+00 : f32
      %14 = vector.broadcast %cst_13 : f32 to vector<8x128xf32>
      %c0_14 = arith.constant 0 : index
      %c0_15 = arith.constant 0 : index
      %15 = vector.load %arg6[%c0_14, %c0_15] : memref<8x128xf32, #tpu.memory_space<vmem>>, vector<8x128xf32>
      tpu.vector_store %arg6[%c0_14, %c0_15], %14 {strides = array<i32>} : memref<8x128xf32, #tpu.memory_space<vmem>>, vector<8x128xf32>,
    } else {
    }
    %c0 = arith.constant 0 : index
    %c0_1 = arith.constant 0 : index
    %3 = vector.load %arg7[%c0, %c0_1] : memref<128x128xf32, #tpu.memory_space<vmem>>, vector<128x128xf32>
    %c0_2 = arith.constant 0 : index
    %c0_3 = arith.constant 0 : index
    %4 = vector.load %arg3[%c0_2, %c0_3] : memref<128x256xbf16, #tpu.memory_space<vmem>>, vector<128x256xbf16>
    %c0_4 = arith.constant 0 : index
    %c0_5 = arith.constant 0 : index
    %5 = vector.load %arg4[%c0_4, %c0_5] : memref<256x128xbf16, #tpu.memory_space<vmem>>, vector<256x128xbf16>
    %cst = arith.constant dense<0.000000e+00> : vector<128x128xf32>
    %6 = tpu.matmul %4, %5, %cst {dimension_numbers = #tpu.dot_dimension_numbers<[1], [0], [0], [1], [0, 0, 1, 1], [], []>} : vector<128x256xbf16>, vector<256x128xbf16>, vector<128x128xf32> -> vector<128x128xf32>
    %7 = arith.addf %3, %6 : vector<128x128xf32>
    %c0_6 = arith.constant 0 : index
    %c0_7 = arith.constant 0 : index
    %8 = vector.load %arg7[%c0_6, %c0_7] : memref<128x128xf32, #tpu.memory_space<vmem>>, vector<128x128xf32>
    tpu.vector_store %arg7[%c0_6, %c0_7], %7 {strides = array<i32>} : memref<128x128xf32, #tpu.memory_space<vmem>>, vector<128x128xf32>,
    %c0_i32_8 = arith.constant 0 : i32
    %9 = arith.cmpi eq, %arg2, %c0_i32_8 : i32
    %10 = arith.extui %9 : i1 to i32
    %c0_i32_9 = arith.constant 0 : i32
    %11 = arith.cmpi ne, %10, %c0_i32_9 : i32
    scf.if %11 {
      %c0_10 = arith.constant 0 : index
      %c0_11 = arith.constant 0 : index
      %12 = vector.load %arg7[%c0_10, %c0_11] : memref<128x128xf32, #tpu.memory_space<vmem>>, vector<128x128xf32>
      %13 = arith.truncf %12 : vector<128x128xf32> to vector<128x128xbf16>
      %c0_12 = arith.constant 0 : index
      %c0_13 = arith.constant 0 : index
      %14 = vector.load %arg5[%c0_12, %c0_13] : memref<128x128xbf16, #tpu.memory_space<vmem>>, vector<128x128xbf16>
      tpu.vector_store %arg5[%c0_12, %c0_13], %13 {strides = array<i32>} : memref<128x128xbf16, #tpu.memory_space<vmem>>, vector<128x128xbf16>,
      %cst_14 = arith.constant dense<0.000000e+00> : vector<128xf32>
      %15 = vector.multi_reduction <add>, %12, %cst_14 [0] : vector<128x128xf32> to vector<128xf32>
      %16 = vector.shape_cast %15 : vector<128xf32> to vector<1x128xf32>
      %c0_15 = arith.constant 0 : index
      %c0_16 = arith.constant 0 : index
      %17 = vector.load %arg6[%c0_15, %c0_16] : memref<8x128xf32, #tpu.memory_space<vmem>>, vector<1x128xf32>
      tpu.vector_store %arg6[%c0_15, %c0_16], %16 {strides = array<i32>} : memref<8x128xf32, #tpu.memory_space<vmem>>, vector<1x128xf32>,
      %18 = arith.mulf %12, %12 : vector<128x128xf32>
      %cst_17 = arith.constant dense<0.000000e+00> : vector<128xf32>
      %19 = vector.multi_reduction <add>, %18, %cst_17 [0] : vector<128x128xf32> to vector<128xf32>
      %20 = vector.shape_cast %19 : vector<128xf32> to vector<1x128xf32>
      %c1 = arith.constant 1 : index
      %c0_18 = arith.constant 0 : index
      %21 = vector.load %arg6[%c1, %c0_18] : memref<8x128xf32, #tpu.memory_space<vmem>>, vector<1x128xf32>
      tpu.vector_store %arg6[%c1, %c0_18], %20 {strides = array<i32>} : memref<8x128xf32, #tpu.memory_space<vmem>>, vector<1x128xf32>,
    } else {
    }
    return
  }
  func.func @transform_0(%arg0: i32, %arg1: i32, %arg2: i32) -> (i32, i32) {
    %c0_i32 = arith.constant 0 : i32
    return %arg0, %arg2 : i32, i32
  }
  func.func @transform_1(%arg0: i32, %arg1: i32, %arg2: i32) -> (i32, i32) {
    %c0_i32 = arith.constant 0 : i32
    return %arg2, %arg1 : i32, i32
  }
  func.func @transform_2(%arg0: i32, %arg1: i32, %arg2: i32) -> (i32, i32) {
    %c0_i32 = arith.constant 0 : i32
    return %arg0, %arg1 : i32, i32
  }
  func.func @transform_3(%arg0: i32, %arg1: i32, %arg2: i32) -> (i32, i32) {
    %c0_i32 = arith.constant 0 : i32
    return %arg0, %arg1 : i32, i32
  }
}

module attributes {stable_mosaic.version = 11 : i64} {
  func.func @_affine_kernel(%arg0: i32, %arg1: memref<1024x128xbf16, #tpu.memory_space<vmem>>, %arg2: memref<1x128xf32, #tpu.memory_space<vmem>>, %arg3: memref<1x128xf32, #tpu.memory_space<vmem>>, %arg4: memref<1024x128xbf16, #tpu.memory_space<vmem>>) attributes {dimension_semantics = [#tpu.dimension_semantics<parallel>], iteration_bounds = array<i64: 2>, scalar_prefetch = 0 : i64, scratch_operands = 0 : i64, tpu.core_type = #tpu.core_type<tc>, window_params = [{transform_indices = @transform_0, window_bounds = array<i64: 1024, 128>}, {pipeline_mode = #tpu.pipeline_mode<synchronous>, transform_indices = @transform_1, window_bounds = array<i64: 1, 128>}, {pipeline_mode = #tpu.pipeline_mode<synchronous>, transform_indices = @transform_2, window_bounds = array<i64: 1, 128>}, {transform_indices = @transform_3, window_bounds = array<i64: 1024, 128>}]} {
    %c0 = arith.constant 0 : index
    %c0_0 = arith.constant 0 : index
    %0 = vector.load %arg1[%c0, %c0_0] : memref<1024x128xbf16, #tpu.memory_space<vmem>>, vector<1024x128xbf16>
    %1 = arith.extf %0 : vector<1024x128xbf16> to vector<1024x128xf32>
    %c0_1 = arith.constant 0 : index
    %c0_2 = arith.constant 0 : index
    %2 = vector.load %arg2[%c0_1, %c0_2] : memref<1x128xf32, #tpu.memory_space<vmem>>, vector<1x128xf32>
    %3 = vector.broadcast %2 : vector<1x128xf32> to vector<1024x128xf32>
    %4 = arith.mulf %1, %3 : vector<1024x128xf32>
    %c0_3 = arith.constant 0 : index
    %c0_4 = arith.constant 0 : index
    %5 = vector.load %arg3[%c0_3, %c0_4] : memref<1x128xf32, #tpu.memory_space<vmem>>, vector<1x128xf32>
    %6 = vector.broadcast %5 : vector<1x128xf32> to vector<1024x128xf32>
    %7 = arith.addf %4, %6 : vector<1024x128xf32>
    %cst = arith.constant 0.000000e+00 : f32
    %8 = vector.broadcast %cst : f32 to vector<1024x128xf32>
    %9 = arith.maximumf %7, %8 : vector<1024x128xf32>
    %10 = arith.truncf %9 : vector<1024x128xf32> to vector<1024x128xbf16>
    %c0_5 = arith.constant 0 : index
    %c0_6 = arith.constant 0 : index
    %11 = vector.load %arg4[%c0_5, %c0_6] : memref<1024x128xbf16, #tpu.memory_space<vmem>>, vector<1024x128xbf16>
    tpu.vector_store %arg4[%c0_5, %c0_6], %10 {strides = array<i32>} : memref<1024x128xbf16, #tpu.memory_space<vmem>>, vector<1024x128xbf16>,
    return
  }
  func.func @transform_0(%arg0: i32) -> (i32, i32) {
    %c0_i32 = arith.constant 0 : i32
    %c0_i32_0 = arith.constant 0 : i32
    return %arg0, %c0_i32 : i32, i32
  }
  func.func @transform_1(%arg0: i32) -> (i32, i32) {
    %c0_i32 = arith.constant 0 : i32
    %c0_i32_0 = arith.constant 0 : i32
    %c0_i32_1 = arith.constant 0 : i32
    return %c0_i32, %c0_i32_0 : i32, i32
  }
  func.func @transform_2(%arg0: i32) -> (i32, i32) {
    %c0_i32 = arith.constant 0 : i32
    %c0_i32_0 = arith.constant 0 : i32
    %c0_i32_1 = arith.constant 0 : i32
    return %c0_i32, %c0_i32_0 : i32, i32
  }
  func.func @transform_3(%arg0: i32) -> (i32, i32) {
    %c0_i32 = arith.constant 0 : i32
    %c0_i32_0 = arith.constant 0 : i32
    return %arg0, %c0_i32 : i32, i32
  }
}

</mosaic_0001>

<bundles_post_ra>
// kernel: _stem_forward.2
= control target key start
LH: loop header
LB: loop body
LE: loop exit
PB: predicated region body
PF: predicated region fallthrough
CT: control target
= control target key end

     0   :  { %s1281_s12 = smov 0   ;;  %s1283_s13 = smov 0   ;;  %s1431_s0 = inlined_call_operand.vmem [shape: bf16[2048,256], index: 0, kind: input, shape index: {}]   ;;  %s1432_s1 = inlined_call_operand.vmem [shape: bf16[256,128], index: 1, kind: input, shape index: {}]   ;;  %s1433_s2 = inlined_call_operand.vmem [shape: bf16[2048,128], index: 2, kind: output, shape index: {0}]   ;;  %s1434_s3 = inlined_call_operand.vmem [shape: f32[128,128], index: 3, kind: output, shape index: {1}]  }
   0x1   :  { %s1285_s14 = smov 0  }
   0x2 LB: > { %s33_s15 = sadd.s32 1, %s1254_s13  ;;  %p970_p0 = scmp.ge.s32.totalorder %s1258_s14, 1  ;;  %s1258_s14 = sphi %s1285_s14, %s14_s14   ;;  %s1254_s13 = sphi %s1283_s13, %s1436_s13   ;;  %s1250_s12 = sphi %s1281_s12, %s1435_s12  }
   0x3   : > { %p35_p1 = scmp.ge.s32.totalorder %s33_s15, 16  ;;  %p188_p2 = scmp.lt.s32.totalorder %s1258_s14, 17 }
   0x5   : > { %s1438_s15 = smov (%p35_p1, %s33_s15), 0  ;;  %p189_p3 = pnand %p970_p0, %p188_p2 }
   0x6   : > { %s971_s18 = sshll.u32 (!%p189_p3), %s1250_s12, 4  ;;  %p265_p5 = scmp.lt.s32.totalorder (!%p189_p3), %s1250_s12, 15 }
   0x7   : > { %192 = sbr.rel (%p189_p3) target bundleno = 303 (0x12f), region = 28  ;;  %p237_p4 = scmp.lt.s32.totalorder (!%p189_p3), %s971_s18, 255 }
   0xc   : > { %v1196_v0 = vld [vmem:[%s1432_s1 + $0x78] sm:$0xff]   ;;  %v1198_v2 = vld [vmem:[%s1432_s1 + $0x70] sm:$0xff]   ;;  %v1200_v4 = vld [vmem:[%s1432_s1 + $0x68] sm:$0xff]   ;;  %s1440_s18 = smov (!%p237_p4, %s971_s18), 255  ;;  %s1442_s12 = smov (!%p265_p5, %s1250_s12), 15  ;;  %v1260_v32 = vmov 0.0  }
   0xd   : > { %v1197_v1 = vld [vmem:[%s1432_s1 + $0x38] sm:$0xff]   ;;  %1091 = vmatprep.subr.bf16.mxu0 %v1196_v0  ;;  %1155 = vmatprep.subr.bf16.mxu1 %v1196_v0  ;;  %v1199_v3 = vld [vmem:[%s1432_s1 + $0x30] sm:$0xff]   ;;  %v1201_v5 = vld [vmem:[%s1432_s1 + $0x28] sm:$0xff]   ;;  %s1027_s6 = sshll.u32 %s1440_s18, 3  ;;  %s976_s4 = sshll.u32 %s1442_s12, 3 }
   0xe   : > { %1092 = vmatpush3.bf16.msra.mxu0 %v1197_v1  ;;  %1163 = vmatpush3.bf16.msra.mxu1 %v1197_v1  ;;  %v1202_v6 = vld [vmem:[%s1432_s1 + $0x60] sm:$0xff]   ;;  %v1204_v8 = vld [vmem:[%s1432_s1 + $0x58] sm:$0xff]   ;;  %s1335_s11 = scalar_lea.vmem %s1431_s0, %s1027_s6  ;;  %v1206_v10 = vld [vmem:[%s1432_s1 + $0x50] sm:$0xff]   ;;  %s1379_s7 = scalar_lea.vmem %s1434_s3, %s976_s4 }
   0xf   : > { %1093 = vmatprep.subr.bf16.mxu0 %v1198_v2  ;;  %1156 = vmatprep.subr.bf16.mxu1 %v1198_v2  ;;  %v1203_v7 = vld [vmem:[%s1432_s1 + $0x20] sm:$0xff]   ;;  %v1205_v9 = vld [vmem:[%s1432_s1 + $0x18] sm:$0xff]   ;;  %v1207_v12 = vld [vmem:[%s1432_s1 + $0x10] sm:$0xff]   ;;  %293 = vst [vmem:[%s1379_s7] sm:$0xff] %v1260_v32  ;;  %s975_s8 = sshll.u32 %s1440_s18, 2 }
  0x10   : > { %v1214_v11 = vld [vmem:[%s1335_s11 + $0x4] ss:$8 sps:$4 sm:$0xff]   ;;  %v1212_v18 = vld [vmem:[%s1335_s11] ss:$8 sps:$4 sm:$0xff]   ;;  %v1215_v20 = vld [vmem:[%s1335_s11 + $0x14] ss:$8 sps:$4 sm:$0xff]   ;;  %s1390_s10 = scalar_lea.vmem %s1433_s2, %s975_s8 }
  0x11   : > { %v1220_v13 = vld [vmem:[%s1335_s11 + $0x44] ss:$8 sps:$4 sm:$0xff]   ;;  %566 = vmatprep.mubr.bf16.mxu0 %v1214_v11  ;;  %v1218_v19 = vld [vmem:[%s1335_s11 + $0x40] ss:$8 sps:$4 sm:$0xff]   ;;  %v1224_v21 = vld [vmem:[%s1335_s11 + $0x54] ss:$8 sps:$4 sm:$0xff]  }
  0x12   : > { %1094 = vmatpush3.bf16.msra.mxu0 %v1199_v3  ;;  %1164 = vmatpush3.bf16.msra.mxu1 %v1199_v3  ;;  %v1208_v14 = vld [vmem:[%s1432_s1 + $0x48] sm:$0xff]   ;;  %v1210_v16 = vld [vmem:[%s1432_s1 + $0x40] sm:$0xff]   ;;  %v1217_v22 = vld [vmem:[%s1335_s11 + $0x10] ss:$8 sps:$4 sm:$0xff]  }
  0x13   : > { %1095 = vmatprep.subr.bf16.mxu0 %v1200_v4  ;;  %1157 = vmatprep.subr.bf16.mxu1 %v1200_v4  ;;  %v1209_v15 = vld [vmem:[%s1432_s1 + $0x8] sm:$0xff]   ;;  %v1211_v17 = vld [vmem:[%s1432_s1] sm:$0xff]   ;;  %v1226_v23 = vld [vmem:[%s1335_s11 + $0x50] ss:$8 sps:$4 sm:$0xff]  }
  0x14   : > { %598 = vmatprep.mubr.bf16.mxu1 %v1220_v13  ;;  %v1221_v24 = vld [vmem:[%s1335_s11 + $0x24] ss:$8 sps:$4 sm:$0xff]   ;;  %v1223_v26 = vld [vmem:[%s1335_s11 + $0x20] ss:$8 sps:$4 sm:$0xff]   ;;  %v1227_v28 = vld [vmem:[%s1335_s11 + $0x34] ss:$8 sps:$4 sm:$0xff]  }
  0x15   : > { %v1230_v25 = vld [vmem:[%s1335_s11 + $0x64] ss:$8 sps:$4 sm:$0xff]   ;;  %v1232_v27 = vld [vmem:[%s1335_s11 + $0x60] ss:$8 sps:$4 sm:$0xff]   ;;  %v1233_v29 = vld [vmem:[%s1335_s11 + $0x74] ss:$8 sps:$4 sm:$0xff]  }
  0x16   : > { %1096 = vmatpush3.bf16.msra.mxu0 %v1201_v5  ;;  %1165 = vmatpush3.bf16.msra.mxu1 %v1201_v5  ;;  %v1229_v30 = vld [vmem:[%s1335_s11 + $0x30] ss:$8 sps:$4 sm:$0xff]  }
  0x17   : > { %1097 = vmatprep.subr.bf16.mxu0 %v1202_v6  ;;  %1158 = vmatprep.subr.bf16.mxu1 %v1202_v6  ;;  %v1235_v31 = vld [vmem:[%s1335_s11 + $0x70] ss:$8 sps:$4 sm:$0xff]  }
  0x1a   : > { %1098 = vmatpush3.bf16.msra.mxu0 %v1203_v7  ;;  %1166 = vmatpush3.bf16.msra.mxu1 %v1203_v7 }
  0x1b   : > { %1099 = vmatprep.subr.bf16.mxu0 %v1204_v8  ;;  %1159 = vmatprep.subr.bf16.mxu1 %v1204_v8 }
  0x1e   : > { %1100 = vmatpush3.bf16.msra.mxu0 %v1205_v9  ;;  %1167 = vmatpush3.bf16.msra.mxu1 %v1205_v9 }
  0x1f   : > { %1101 = vmatprep.subr.bf16.mxu0 %v1206_v10  ;;  %1160 = vmatprep.subr.bf16.mxu1 %v1206_v10 }
  0x22   : > { %1102 = vmatpush3.bf16.msra.mxu0 %v1207_v12  ;;  %1168 = vmatpush3.bf16.msra.mxu1 %v1207_v12 }
  0x23   : > { %1103 = vmatprep.subr.bf16.mxu0 %v1208_v14  ;;  %1161 = vmatprep.subr.bf16.mxu1 %v1208_v14 }
  0x26   : > { %1104 = vmatpush3.bf16.msra.mxu0 %v1209_v15  ;;  %1169 = vmatpush3.bf16.msra.mxu1 %v1209_v15 }
  0x27   : > { %1105 = vmatprep.subr.bf16.mxu0 %v1210_v16  ;;  %1162 = vmatprep.subr.bf16.mxu1 %v1210_v16 }
  0x2a   : > { %1106 = vmatpush3.bf16.msra.mxu0 %v1211_v17  ;;  %1170 = vmatpush3.bf16.msra.mxu1 %v1211_v17 }
  0x2d   : > { %567 = vmatmul.mubr.bf16.vlgmr.msra.gmra.mxu0 %v1212_v18  ;;  %599 = vmatmul.mubr.bf16.vlgmr.msra.gmra.mxu1 %v1218_v19 }
  0x2e   : > { %574 = vmatprep.mubr.bf16.mxu0 %v1215_v20  ;;  %606 = vmatprep.mubr.bf16.mxu1 %v1224_v21 }
  0x35   : > { %575 = vmatmul.mubr.bf16.gmra.mxu0 %v1217_v22  ;;  %607 = vmatmul.mubr.bf16.gmra.mxu1 %v1226_v23 }
  0x36   : > { %582 = vmatprep.mubr.bf16.mxu0 %v1221_v24  ;;  %614 = vmatprep.mubr.bf16.mxu1 %v1230_v25 }
  0x3d   : > { %583 = vmatmul.mubr.bf16.gmra.mxu0 %v1223_v26  ;;  %615 = vmatmul.mubr.bf16.gmra.mxu1 %v1232_v27 }
  0x3e   : > { %590 = vmatprep.mubr.bf16.mxu0 %v1227_v28  ;;  %622 = vmatprep.mubr.bf16.mxu1 %v1233_v29 }
  0x45   : > { %591 = vmatmul.mubr.bf16.gmra.mxu0 %v1229_v30  ;;  %623 = vmatmul.mubr.bf16.gmra.mxu1 %v1235_v31 }
  0xed   : > { %v1107_v33 = vpop.f32.mrf.mxu0  ;;  %v1131_v34 = vpop.f32.mrf.mxu1 }
  0xef   : > { %v1108_v35 = vpop.f32.mrf.mxu0  ;;  %v1132_v36 = vpop.f32.mrf.mxu1 }
  0xf0   : > { %v1383_v39 = vadd.f32 %v1132_v36, %v1131_v34  ;;  %v1109_v42 = vadd.f32 %v1108_v35, %v1107_v33 }
  0xf1   : > { %v1110_v37 = vpop.f32.mrf.mxu0  ;;  %v1134_v38 = vpop.f32.mrf.mxu1 }
  0xf2   : > { %v784_v2 = vmul.f32 %v1109_v42, %v1109_v42 }
  0xf3   : > { %v1111_v40 = vpop.f32.mrf.mxu0  ;;  %v1135_v41 = vpop.f32.mrf.mxu1 }
  0xf4   : > { %v1112_v43 = vadd.f32 %v1111_v40, %v1110_v37  ;;  %v1385_v44 = vadd.f32 %v1135_v41, %v1134_v38 }
  0xf5   : > { %v1113_v45 = vpop.f32.mrf.mxu0  ;;  %v1137_v46 = vpop.f32.mrf.mxu1 }
  0xf6   : > { %v1047_v47 = vpack.c.bf16 %v1112_v43, %v1109_v42  ;;  %v1067_v48 = vpack.c.bf16 %v1385_v44, %v1383_v39  ;;  %v785_v63 = vmul.f32 %v1112_v43, %v1112_v43  ;;  %v762_v7 = vadd.f32 %v1112_v43, %v1109_v42 }
  0xf7   : > { %v1114_v49 = vpop.f32.mrf.mxu0  ;;  %v1138_v50 = vpop.f32.mrf.mxu1 }
  0xf8   : > { %1048 = vst [vmem:[%s1390_s10] sm:$0xff] %v1047_v47   ;;  %1087 = vst [vmem:[%s1390_s10 + $0x20] sm:$0xff] %v1067_v48   ;;  %v1396_v53 = vadd.f32 %v1138_v50, %v1137_v46  ;;  %v1115_v56 = vadd.f32 %v1114_v49, %v1113_v45  ;;  %v800_v9 = vadd.f32 %v785_v63, %v784_v2 }
  0xf9   : > { %v1116_v51 = vpop.f32.mrf.mxu0  ;;  %v1140_v52 = vpop.f32.mrf.mxu1  ;;  %v792_v48 = vmul.f32 %v1383_v39, %v1383_v39 }
  0xfa   : > { %v786_v3 = vmul.f32 %v1115_v56, %v1115_v56  ;;  %v763_v13 = vadd.f32 %v1115_v56, %v762_v7 }
  0xfb   : > { %v1117_v54 = vpop.f32.mrf.mxu0  ;;  %v1141_v55 = vpop.f32.mrf.mxu1 }
  0xfc   : > { %v1118_v57 = vadd.f32 %v1117_v54, %v1116_v51  ;;  %v1398_v58 = vadd.f32 %v1141_v55, %v1140_v52  ;;  %v801_v16 = vadd.f32 %v800_v9, %v786_v3  ;;  %v793_v51 = vmul.f32 %v1385_v44, %v1385_v44 }
  0xfd   : > { %v1119_v59 = vpop.f32.mrf.mxu0  ;;  %v1143_v60 = vpop.f32.mrf.mxu1  ;;  %v794_v55 = vmul.f32 %v1396_v53, %v1396_v53 }
  0xfe   : > { %v1052_v61 = vpack.c.bf16 %v1118_v57, %v1115_v56  ;;  %v1072_v62 = vpack.c.bf16 %v1398_v58, %v1396_v53  ;;  %v787_v10 = vmul.f32 %v1118_v57, %v1118_v57  ;;  %v764_v20 = vadd.f32 %v1118_v57, %v763_v13 }
  0xff   : > { %v1120_v0 = vpop.f32.mrf.mxu0  ;;  %v1144_v1 = vpop.f32.mrf.mxu1 }
 0x100   : > { %1084 = vst [vmem:[%s1390_s10 + $0x8] sm:$0xff] %v1052_v61   ;;  %1088 = vst [vmem:[%s1390_s10 + $0x28] sm:$0xff] %v1072_v62   ;;  %v1121_v4 = vadd.f32 %v1120_v0, %v1119_v59  ;;  %v1145_v8 = vadd.f32 %v1144_v1, %v1143_v60  ;;  %v802_v23 = vadd.f32 %v801_v16, %v787_v10 }
 0x101   : > { %v1122_v5 = vpop.f32.mrf.mxu0  ;;  %v1146_v6 = vpop.f32.mrf.mxu1  ;;  %v795_v59 = vmul.f32 %v1398_v58, %v1398_v58 }
 0x102   : > { %v788_v17 = vmul.f32 %v1121_v4, %v1121_v4  ;;  %v765_v27 = vadd.f32 %v1121_v4, %v764_v20  ;;  %v796_v61 = vmul.f32 %v1145_v8, %v1145_v8 }
 0x103   : > { %v1123_v11 = vpop.f32.mrf.mxu0  ;;  %v1147_v12 = vpop.f32.mrf.mxu1 }
 0x104   : > { %v1124_v14 = vadd.f32 %v1123_v11, %v1122_v5  ;;  %v1148_v15 = vadd.f32 %v1147_v12, %v1146_v6  ;;  %v803_v29 = vadd.f32 %v802_v23, %v788_v17 }
 0x105   : > { %v1125_v18 = vpop.f32.mrf.mxu0  ;;  %v1149_v19 = vpop.f32.mrf.mxu1 }
 0x106   : > { %v1057_v21 = vpack.c.bf16 %v1124_v14, %v1121_v4  ;;  %v1077_v22 = vpack.c.bf16 %v1148_v15, %v1145_v8  ;;  %v789_v24 = vmul.f32 %v1124_v14, %v1124_v14  ;;  %v766_v32 = vadd.f32 %v1124_v14, %v765_v27 }
 0x107   : > { %v1126_v25 = vpop.f32.mrf.mxu0  ;;  %v1150_v26 = vpop.f32.mrf.mxu1  ;;  %v797_v1 = vmul.f32 %v1148_v15, %v1148_v15 }
 0x108   : > { %1085 = vst [vmem:[%s1390_s10 + $0x10] sm:$0xff] %v1057_v21   ;;  %v1127_v28 = vadd.f32 %v1126_v25, %v1125_v18  ;;  %1089 = vst [vmem:[%s1390_s10 + $0x30] sm:$0xff] %v1077_v22   ;;  %v1151_v34 = vadd.f32 %v1150_v26, %v1149_v19  ;;  %v804_v35 = vadd.f32 %v803_v29, %v789_v24 }
 0x109   : > { %v1128_v30 = vpop.f32.mrf.mxu0  ;;  %v1152_v31 = vpop.f32.mrf.mxu1 }
 0x10a   : > { %v790_v33 = vmul.f32 %v1127_v28, %v1127_v28  ;;  %v767_v38 = vadd.f32 %v1127_v28, %v766_v32  ;;  %v798_v4 = vmul.f32 %v1151_v34, %v1151_v34 }
 0x10b   : > { %v1129_v36 = vpop.f32.mrf.mxu0  ;;  %v1153_v37 = vpop.f32.mrf.mxu1 }
 0x10c   : > { %v1130_v40 = vadd.f32 %v1129_v36, %v1128_v30  ;;  %v1154_v41 = vadd.f32 %v1153_v37, %v1152_v31  ;;  %v805_v42 = vadd.f32 %v804_v35, %v790_v33 }
 0x10e   : > { %v1062_v43 = vpack.c.bf16 %v1130_v40, %v1127_v28  ;;  %v768_v45 = vadd.f32 %v1130_v40, %v767_v38  ;;  %v791_v46 = vmul.f32 %v1130_v40, %v1130_v40  ;;  %v1082_v47 = vpack.c.bf16 %v1154_v41, %v1151_v34 }
 0x110   : > { %1086 = vst [vmem:[%s1390_s10 + $0x18] sm:$0xff] %v1062_v43   ;;  %v769_v49 = vadd.f32 %v1383_v39, %v768_v45  ;;  %v806_v50 = vadd.f32 %v805_v42, %v791_v46  ;;  %1090 = vst [vmem:[%s1390_s10 + $0x38] sm:$0xff] %v1082_v47  }
 0x112   : > { %v770_v52 = vadd.f32 %v1385_v44, %v769_v49  ;;  %v807_v54 = vadd.f32 %v806_v50, %v792_v48 }
 0x114   : > { %v808_v56 = vadd.f32 %v807_v54, %v793_v51  ;;  %v771_v57 = vadd.f32 %v1396_v53, %v770_v52  ;;  %v799_v53 = vmul.f32 %v1154_v41, %v1154_v41 }
 0x116   : > { %v772_v60 = vadd.f32 %v1398_v58, %v771_v57  ;;  %v809_v39 = vadd.f32 %v808_v56, %v794_v55 }
 0x118   : > { %v773_v62 = vadd.f32 %v1145_v8, %v772_v60  ;;  %v810_v63 = vadd.f32 %v809_v39, %v795_v59 }
 0x11a   : > { %v774_v0 = vadd.f32 %v1148_v15, %v773_v62  ;;  %v811_v2 = vadd.f32 %v810_v63, %v796_v61 }
 0x11c   : > { %v812_v44 = vadd.f32 %v811_v2, %v797_v1  ;;  %v775_v3 = vadd.f32 %v1151_v34, %v774_v0 }
 0x11e   : > { %v813_v5 = vadd.f32 %v812_v44, %v798_v4  ;;  %v776_v6 = vadd.f32 %v1154_v41, %v775_v3 }
 0x120   : > { %v777_v7 = vrot.slane %v776_v6, 4  ;;  %v814_v9 = vadd.f32 %v813_v5, %v799_v53 }
 0x122   : > { %v778_v10 = vadd.f32 %v777_v7, %v776_v6  ;;  %v815_v11 = vrot.slane %v814_v9, 4 }
 0x124   : > { %v779_v58 = vrot.slane %v778_v10, 2  ;;  %v816_v12 = vadd.f32 %v815_v11, %v814_v9 }
 0x126   : > { %v780_v13 = vadd.f32 %v779_v58, %v778_v10  ;;  %v817_v8 = vrot.slane %v816_v12, 2 }
 0x128   : > { %v781_v14 = vrot.slane %v780_v13, 1  ;;  %v818_v16 = vadd.f32 %v817_v8, %v816_v12 }
 0x12a   : > { %v782_v15 = vadd.f32 %v781_v14, %v780_v13  ;;  %v819_v17 = vrot.slane %v818_v16, 1 }
 0x12c   : > { %783 = vst [vmem:[%s1379_s7] sm:$0x1] %v782_v15  ;;  %v820_v18 = vadd.f32 %v819_v17, %v818_v16 }
 0x12e   : > { %821 = vst [vmem:[%s1379_s7 + $0x1] sm:$0x1] %v820_v18 }
 0x12f PF: > { %s14_s14 = sadd.s32 1, %s1258_s14   ;;  %s1435_s12 = smov %s1254_s13 }
 0x130   : > { %p11_p6 = scmp.ge.s32.totalorder %s14_s14, 18   ;;  %s1436_s13 = smov %s1438_s15 }
 0x132   :  { %13 = sbr.rel (!%p11_p6) target bundleno = 2 (0x2), region = 81 }

// kernel: _stem_forward.3
= control target key start
LH: loop header
LB: loop body
LE: loop exit
PB: predicated region body
PF: predicated region fallthrough
CT: control target
= control target key end

     0   :  { %s2533_s12 = smov 0   ;;  %s2965_s0 = inlined_call_operand.vmem [shape: bf16[2048,128], index: 0, kind: input, shape index: {}]   ;;  %s2966_s1 = inlined_call_operand.vmem [shape: f32[1,128], index: 1, kind: input, shape index: {}]   ;;  %s2967_s2 = inlined_call_operand.vmem [shape: f32[1,128], index: 2, kind: input, shape index: {}]   ;;  %s2968_s3 = inlined_call_operand.vmem [shape: bf16[2048,128], index: 3, kind: output, shape index: {}]  }
   0x1 LB: > { %s1524_s13 = sadd.s32 4294967295, %s2511_s12   ;;  %p1528_p0 = scmp.ge.s32.totalorder %s2511_s12, 1  ;;  %s2511_s12 = sphi %s2533_s12, %s13_s12  }
   0x2   : > { %p138_p1 = scmp.lt.s32.totalorder %s2511_s12, 3 }
   0x4   : > { %p139_p2 = pnand %p1528_p0, %p138_p1 }
   0x5   : > { %s1529_s14 = sshll.u32 (!%p139_p2), %s1524_s13, 7 }
   0x6   : > { %142 = sbr.rel (%p139_p2) target bundleno = 165 (0xa5), region = 32  ;;  %p163_p3 = scmp.lt.s32.totalorder (!%p139_p2), %s1529_s14, 255 }
   0xb   : > { %s2970_s14 = smov (!%p163_p3, %s1529_s14), 255  ;;  %v2554_v0 = vld [vmem:[%s2966_s1] ss:$0 sm:$0xff] }
   0xc   : > { %s1530_s15 = sshll.u32 %s2970_s14, 2  ;;  %v2563_v9 = vld [vmem:[%s2967_s2] ss:$0 sm:$0xff] }
   0xd   : > { %s2549_s18 = scalar_lea.vmem %s2965_s0, %s1530_s15  ;;  %s2588_s25 = scalar_lea.vmem %s2968_s3, %s1530_s15 }
   0xe   : > { %v1794_v1 = vld [vmem:[%s2549_s18] sm:$0xff]   ;;  %v2369_v2 = vld [vmem:[%s2549_s18 + $0x8] sm:$0xff]   ;;  %v2370_v3 = vld [vmem:[%s2549_s18 + $0x10] sm:$0xff]  }
   0xf   : > { %v1795_v4 = vunpack.c.l.bf16 %v1794_v1  ;;  %v1796_v5 = vunpack.c.h.bf16 %v1794_v1  ;;  %v1799_v6 = vunpack.c.l.bf16 %v2369_v2  ;;  %v1800_v7 = vunpack.c.h.bf16 %v2369_v2  ;;  %v2371_v8 = vld [vmem:[%s2549_s18 + $0x18] sm:$0xff]   ;;  %v2372_v30 = vld [vmem:[%s2549_s18 + $0x20] sm:$0xff]   ;;  %v2373_v35 = vld [vmem:[%s2549_s18 + $0x28] sm:$0xff]  }
  0x10   : > { %v1803_v10 = vunpack.c.l.bf16 %v2370_v3  ;;  %v1804_v11 = vunpack.c.h.bf16 %v2370_v3  ;;  %v1807_v12 = vunpack.c.l.bf16 %v2371_v8  ;;  %v1808_v13 = vunpack.c.h.bf16 %v2371_v8  ;;  %v2374_v40 = vld [vmem:[%s2549_s18 + $0x30] sm:$0xff]   ;;  %v2375_v45 = vld [vmem:[%s2549_s18 + $0x38] sm:$0xff]   ;;  %v2376_v3 = vld [vmem:[%s2549_s18 + $0x40] sm:$0xff]  }
  0x11   : > { %v437_v14 = vmul.f32 %v1795_v4, %v2554_v0  ;;  %v438_v15 = vmul.f32 %v1796_v5, %v2554_v0  ;;  %v439_v16 = vmul.f32 %v1799_v6, %v2554_v0  ;;  %v440_v17 = vmul.f32 %v1800_v7, %v2554_v0 }
  0x12   : > { %v441_v18 = vmul.f32 %v1803_v10, %v2554_v0  ;;  %v442_v19 = vmul.f32 %v1804_v11, %v2554_v0  ;;  %v443_v20 = vmul.f32 %v1807_v12, %v2554_v0  ;;  %v444_v21 = vmul.f32 %v1808_v13, %v2554_v0  ;;  %v2377_v13 = vld [vmem:[%s2549_s18 + $0x48] sm:$0xff]  }
  0x13   : > { %v572_v22 = vadd.f32 %v2563_v9, %v437_v14  ;;  %v573_v23 = vadd.f32 %v2563_v9, %v438_v15  ;;  %v574_v24 = vadd.f32 %v2563_v9, %v439_v16  ;;  %v575_v25 = vadd.f32 %v2563_v9, %v440_v17 }
  0x14   : > { %v576_v26 = vadd.f32 %v2563_v9, %v441_v18  ;;  %v577_v27 = vadd.f32 %v2563_v9, %v442_v19  ;;  %v578_v28 = vadd.f32 %v2563_v9, %v443_v20  ;;  %v579_v29 = vadd.f32 %v2563_v9, %v444_v21  ;;  %v2378_v18 = vld [vmem:[%s2549_s18 + $0x50] sm:$0xff]  }
  0x15   : > { %v700_v31 = vmax.f32 %v572_v22, 0.0  ;;  %v701_v32 = vmax.f32 %v573_v23, 0.0  ;;  %v702_v33 = vmax.f32 %v574_v24, 0.0  ;;  %v703_v34 = vmax.f32 %v575_v25, 0.0  ;;  %v2379_v23 = vld [vmem:[%s2549_s18 + $0x58] sm:$0xff]  }
  0x16   : > { %v704_v36 = vmax.f32 %v576_v26, 0.0  ;;  %v705_v37 = vmax.f32 %v577_v27, 0.0  ;;  %v706_v38 = vmax.f32 %v578_v28, 0.0  ;;  %v707_v39 = vmax.f32 %v579_v29, 0.0 }
  0x17   : > { %v2052_v41 = vpack.c.bf16 %v701_v32, %v700_v31  ;;  %v2057_v42 = vpack.c.bf16 %v703_v34, %v702_v33  ;;  %v1811_v43 = vunpack.c.l.bf16 %v2372_v30  ;;  %v1812_v44 = vunpack.c.h.bf16 %v2372_v30 }
  0x18   : > { %v2062_v46 = vpack.c.bf16 %v705_v37, %v704_v36  ;;  %v2067_v47 = vpack.c.bf16 %v707_v39, %v706_v38  ;;  %v1815_v48 = vunpack.c.l.bf16 %v2373_v35  ;;  %v1816_v49 = vunpack.c.h.bf16 %v2373_v35 }
  0x19   : > { %2053 = vst [vmem:[%s2588_s25] sm:$0xff] %v2052_v41   ;;  %2432 = vst [vmem:[%s2588_s25 + $0x8] sm:$0xff] %v2057_v42   ;;  %v445_v50 = vmul.f32 %v1811_v43, %v2554_v0  ;;  %v446_v51 = vmul.f32 %v1812_v44, %v2554_v0  ;;  %v1819_v52 = vunpack.c.l.bf16 %v2374_v40  ;;  %v1820_v53 = vunpack.c.h.bf16 %v2374_v40  ;;  %v2380_v40 = vld [vmem:[%s2549_s18 + $0x60] sm:$0xff]  }
  0x1a   : > { %2433 = vst [vmem:[%s2588_s25 + $0x10] sm:$0xff] %v2062_v46   ;;  %2434 = vst [vmem:[%s2588_s25 + $0x18] sm:$0xff] %v2067_v47   ;;  %v447_v54 = vmul.f32 %v1815_v48, %v2554_v0  ;;  %v448_v55 = vmul.f32 %v1816_v49, %v2554_v0  ;;  %v1823_v56 = vunpack.c.l.bf16 %v2375_v45  ;;  %v1824_v57 = vunpack.c.h.bf16 %v2375_v45 }
  0x1b   : > { %v580_v58 = vadd.f32 %v2563_v9, %v445_v50  ;;  %v581_v59 = vadd.f32 %v2563_v9, %v446_v51  ;;  %v449_v60 = vmul.f32 %v1819_v52, %v2554_v0  ;;  %v450_v61 = vmul.f32 %v1820_v53, %v2554_v0  ;;  %v2381_v53 = vld [vmem:[%s2549_s18 + $0x68] sm:$0xff]  }
  0x1c   : > { %v582_v62 = vadd.f32 %v2563_v9, %v447_v54  ;;  %v583_v63 = vadd.f32 %v2563_v9, %v448_v55  ;;  %v451_v1 = vmul.f32 %v1823_v56, %v2554_v0  ;;  %v452_v2 = vmul.f32 %v1824_v57, %v2554_v0 }
  0x1d   : > { %v708_v4 = vmax.f32 %v580_v58, 0.0  ;;  %v709_v5 = vmax.f32 %v581_v59, 0.0  ;;  %v584_v6 = vadd.f32 %v2563_v9, %v449_v60  ;;  %v585_v7 = vadd.f32 %v2563_v9, %v450_v61  ;;  %v2382_v58 = vld [vmem:[%s2549_s18 + $0x70] sm:$0xff]  }
  0x1e   : > { %v710_v8 = vmax.f32 %v582_v62, 0.0  ;;  %v711_v10 = vmax.f32 %v583_v63, 0.0  ;;  %v586_v11 = vadd.f32 %v2563_v9, %v451_v1  ;;  %v587_v12 = vadd.f32 %v2563_v9, %v452_v2  ;;  %v2383_v63 = vld [vmem:[%s2549_s18 + $0x78] sm:$0xff]  }
  0x1f   : > { %v2072_v14 = vpack.c.bf16 %v709_v5, %v708_v4  ;;  %v712_v15 = vmax.f32 %v584_v6, 0.0  ;;  %v713_v16 = vmax.f32 %v585_v7, 0.0  ;;  %v1827_v17 = vunpack.c.l.bf16 %v2376_v3 }
  0x20   : > { %v2077_v19 = vpack.c.bf16 %v711_v10, %v710_v8  ;;  %v714_v20 = vmax.f32 %v586_v11, 0.0  ;;  %v715_v21 = vmax.f32 %v587_v12, 0.0  ;;  %v1828_v22 = vunpack.c.h.bf16 %v2376_v3 }
  0x21   : > { %2435 = vst [vmem:[%s2588_s25 + $0x20] sm:$0xff] %v2072_v14   ;;  %v2082_v24 = vpack.c.bf16 %v713_v16, %v712_v15  ;;  %v453_v25 = vmul.f32 %v1827_v17, %v2554_v0  ;;  %v1831_v26 = vunpack.c.l.bf16 %v2377_v13  ;;  %v1832_v27 = vunpack.c.h.bf16 %v2377_v13  ;;  %v2384_v14 = vld [vmem:[%s2549_s18 + $0x80] sm:$0xff]  }
  0x22   : > { %2436 = vst [vmem:[%s2588_s25 + $0x28] sm:$0xff] %v2077_v19   ;;  %v2087_v28 = vpack.c.bf16 %v715_v21, %v714_v20  ;;  %v454_v29 = vmul.f32 %v1828_v22, %v2554_v0  ;;  %v1835_v30 = vunpack.c.l.bf16 %v2378_v18  ;;  %v1836_v31 = vunpack.c.h.bf16 %v2378_v18 }
  0x23   : > { %2437 = vst [vmem:[%s2588_s25 + $0x30] sm:$0xff] %v2082_v24   ;;  %v588_v32 = vadd.f32 %v2563_v9, %v453_v25  ;;  %v455_v33 = vmul.f32 %v1831_v26, %v2554_v0  ;;  %v456_v34 = vmul.f32 %v1832_v27, %v2554_v0  ;;  %v1839_v35 = vunpack.c.l.bf16 %v2379_v23 }
  0x24   : > { %2438 = vst [vmem:[%s2588_s25 + $0x38] sm:$0xff] %v2087_v28   ;;  %v589_v36 = vadd.f32 %v2563_v9, %v454_v29  ;;  %v457_v37 = vmul.f32 %v1835_v30, %v2554_v0  ;;  %v458_v38 = vmul.f32 %v1836_v31, %v2554_v0  ;;  %v1840_v39 = vunpack.c.h.bf16 %v2379_v23  ;;  %v2385_v31 = vld [vmem:[%s2549_s18 + $0x88] sm:$0xff]  }
  0x25   : > { %v716_v41 = vmax.f32 %v588_v32, 0.0  ;;  %v590_v42 = vadd.f32 %v2563_v9, %v455_v33  ;;  %v591_v43 = vadd.f32 %v2563_v9, %v456_v34  ;;  %v459_v44 = vmul.f32 %v1839_v35, %v2554_v0 }
  0x26   : > { %v717_v45 = vmax.f32 %v589_v36, 0.0  ;;  %v592_v46 = vadd.f32 %v2563_v9, %v457_v37  ;;  %v593_v47 = vadd.f32 %v2563_v9, %v458_v38  ;;  %v460_v48 = vmul.f32 %v1840_v39, %v2554_v0  ;;  %v2386_v36 = vld [vmem:[%s2549_s18 + $0x90] sm:$0xff]  }
  0x27   : > { %v718_v49 = vmax.f32 %v590_v42, 0.0  ;;  %v719_v50 = vmax.f32 %v591_v43, 0.0  ;;  %v594_v51 = vadd.f32 %v2563_v9, %v459_v44  ;;  %v1843_v52 = vunpack.c.l.bf16 %v2380_v40 }
  0x28   : > { %v2092_v54 = vpack.c.bf16 %v717_v45, %v716_v41  ;;  %v720_v55 = vmax.f32 %v592_v46, 0.0  ;;  %v721_v56 = vmax.f32 %v593_v47, 0.0  ;;  %v595_v57 = vadd.f32 %v2563_v9, %v460_v48  ;;  %v2387_v41 = vld [vmem:[%s2549_s18 + $0x98] sm:$0xff]  }
  0x29   : > { %v2097_v59 = vpack.c.bf16 %v719_v50, %v718_v49  ;;  %v722_v60 = vmax.f32 %v594_v51, 0.0  ;;  %v1844_v61 = vunpack.c.h.bf16 %v2380_v40  ;;  %v461_v62 = vmul.f32 %v1843_v52, %v2554_v0 }
  0x2a   : > { %2439 = vst [vmem:[%s2588_s25 + $0x40] sm:$0xff] %v2092_v54   ;;  %v2102_v1 = vpack.c.bf16 %v721_v56, %v720_v55  ;;  %v723_v2 = vmax.f32 %v595_v57, 0.0  ;;  %v1847_v3 = vunpack.c.l.bf16 %v2381_v53  ;;  %v1848_v4 = vunpack.c.h.bf16 %v2381_v53  ;;  %v2388_v54 = vld [vmem:[%s2549_s18 + $0xa0] sm:$0xff]  }
  0x2b   : > { %2440 = vst [vmem:[%s2588_s25 + $0x48] sm:$0xff] %v2097_v59   ;;  %v462_v5 = vmul.f32 %v1844_v61, %v2554_v0  ;;  %v596_v6 = vadd.f32 %v2563_v9, %v461_v62  ;;  %v1851_v7 = vunpack.c.l.bf16 %v2382_v58  ;;  %v1852_v8 = vunpack.c.h.bf16 %v2382_v58 }
  0x2c   : > { %2441 = vst [vmem:[%s2588_s25 + $0x50] sm:$0xff] %v2102_v1   ;;  %v2107_v10 = vpack.c.bf16 %v723_v2, %v722_v60  ;;  %v463_v11 = vmul.f32 %v1847_v3, %v2554_v0  ;;  %v464_v12 = vmul.f32 %v1848_v4, %v2554_v0  ;;  %v1855_v13 = vunpack.c.l.bf16 %v2383_v63  ;;  %v2389_v4 = vld [vmem:[%s2549_s18 + $0xa8] sm:$0xff]  }
  0x2d   : > { %v597_v15 = vadd.f32 %v2563_v9, %v462_v5  ;;  %v724_v16 = vmax.f32 %v596_v6, 0.0  ;;  %v465_v17 = vmul.f32 %v1851_v7, %v2554_v0  ;;  %v466_v18 = vmul.f32 %v1852_v8, %v2554_v0 }
  0x2e   : > { %2442 = vst [vmem:[%s2588_s25 + $0x58] sm:$0xff] %v2107_v10   ;;  %v598_v19 = vadd.f32 %v2563_v9, %v463_v11  ;;  %v599_v20 = vadd.f32 %v2563_v9, %v464_v12  ;;  %v1856_v21 = vunpack.c.h.bf16 %v2383_v63  ;;  %v467_v22 = vmul.f32 %v1855_v13, %v2554_v0 }
  0x2f   : > { %v725_v23 = vmax.f32 %v597_v15, 0.0  ;;  %v600_v24 = vadd.f32 %v2563_v9, %v465_v17  ;;  %v601_v25 = vadd.f32 %v2563_v9, %v466_v18  ;;  %v1859_v26 = vunpack.c.l.bf16 %v2384_v14 }
  0x30   : > { %v726_v27 = vmax.f32 %v598_v19, 0.0  ;;  %v727_v28 = vmax.f32 %v599_v20, 0.0  ;;  %v468_v29 = vmul.f32 %v1856_v21, %v2554_v0  ;;  %v602_v30 = vadd.f32 %v2563_v9, %v467_v22  ;;  %v2391_v19 = vld [vmem:[%s2549_s18 + $0xb8] sm:$0xff]  }
  0x31   : > { %v2112_v32 = vpack.c.bf16 %v725_v23, %v724_v16  ;;  %v728_v33 = vmax.f32 %v600_v24, 0.0  ;;  %v729_v34 = vmax.f32 %v601_v25, 0.0  ;;  %v1860_v35 = vunpack.c.h.bf16 %v2384_v14  ;;  %v2390_v14 = vld [vmem:[%s2549_s18 + $0xb0] sm:$0xff]  }
  0x32   : > { %v2117_v37 = vpack.c.bf16 %v727_v28, %v726_v27  ;;  %v603_v38 = vadd.f32 %v2563_v9, %v468_v29  ;;  %v730_v39 = vmax.f32 %v602_v30, 0.0  ;;  %v469_v40 = vmul.f32 %v1859_v26, %v2554_v0 }
  0x33   : > { %2443 = vst [vmem:[%s2588_s25 + $0x60] sm:$0xff] %v2112_v32   ;;  %v2122_v42 = vpack.c.bf16 %v729_v34, %v728_v33  ;;  %v470_v43 = vmul.f32 %v1860_v35, %v2554_v0  ;;  %v1863_v44 = vunpack.c.l.bf16 %v2385_v31  ;;  %v1864_v45 = vunpack.c.h.bf16 %v2385_v31  ;;  %v2392_v32 = vld [vmem:[%s2549_s18 + $0xc0] sm:$0xff]  }
  0x34   : > { %2444 = vst [vmem:[%s2588_s25 + $0x68] sm:$0xff] %v2117_v37   ;;  %v731_v46 = vmax.f32 %v603_v38, 0.0  ;;  %v604_v47 = vadd.f32 %v2563_v9, %v469_v40  ;;  %v1867_v48 = vunpack.c.l.bf16 %v2386_v36  ;;  %v1868_v49 = vunpack.c.h.bf16 %v2386_v36 }
  0x35   : > { %2445 = vst [vmem:[%s2588_s25 + $0x70] sm:$0xff] %v2122_v42   ;;  %v605_v50 = vadd.f32 %v2563_v9, %v470_v43  ;;  %v471_v51 = vmul.f32 %v1863_v44, %v2554_v0  ;;  %v472_v52 = vmul.f32 %v1864_v45, %v2554_v0  ;;  %v1871_v53 = vunpack.c.l.bf16 %v2387_v41  ;;  %v2393_v45 = vld [vmem:[%s2549_s18 + $0xc8] sm:$0xff]  }
  0x36   : > { %v2127_v55 = vpack.c.bf16 %v731_v46, %v730_v39  ;;  %v732_v56 = vmax.f32 %v604_v47, 0.0  ;;  %v473_v57 = vmul.f32 %v1867_v48, %v2554_v0  ;;  %v474_v58 = vmul.f32 %v1868_v49, %v2554_v0 }
  0x37   : > { %v733_v59 = vmax.f32 %v605_v50, 0.0  ;;  %v606_v60 = vadd.f32 %v2563_v9, %v471_v51  ;;  %v607_v61 = vadd.f32 %v2563_v9, %v472_v52  ;;  %v1872_v62 = vunpack.c.h.bf16 %v2387_v41 }
  0x38   : > { %2446 = vst [vmem:[%s2588_s25 + $0x78] sm:$0xff] %v2127_v55   ;;  %v608_v63 = vadd.f32 %v2563_v9, %v473_v57  ;;  %v609_v1 = vadd.f32 %v2563_v9, %v474_v58  ;;  %v475_v2 = vmul.f32 %v1871_v53, %v2554_v0  ;;  %v1875_v3 = vunpack.c.l.bf16 %v2388_v54 }
  0x39   : > { %v2132_v5 = vpack.c.bf16 %v733_v59, %v732_v56  ;;  %v734_v6 = vmax.f32 %v606_v60, 0.0  ;;  %v735_v7 = vmax.f32 %v607_v61, 0.0  ;;  %v476_v8 = vmul.f32 %v1872_v62, %v2554_v0 }
  0x3a   : > { %v736_v10 = vmax.f32 %v608_v63, 0.0  ;;  %v737_v11 = vmax.f32 %v609_v1, 0.0  ;;  %v610_v12 = vadd.f32 %v2563_v9, %v475_v2  ;;  %v1876_v13 = vunpack.c.h.bf16 %v2388_v54  ;;  %v2394_v54 = vld [vmem:[%s2549_s18 + $0xd0] sm:$0xff]   ;;  %v2395_v63 = vld [vmem:[%s2549_s18 + $0xd8] sm:$0xff]  }
  0x3b   : > { %2447 = vst [vmem:[%s2588_s25 + $0x80] sm:$0xff] %v2132_v5   ;;  %v2137_v15 = vpack.c.bf16 %v735_v7, %v734_v6  ;;  %v611_v16 = vadd.f32 %v2563_v9, %v476_v8  ;;  %v477_v17 = vmul.f32 %v1875_v3, %v2554_v0  ;;  %v1879_v18 = vunpack.c.l.bf16 %v2389_v4 }
  0x3c   : > { %v2142_v20 = vpack.c.bf16 %v737_v11, %v736_v10  ;;  %v738_v21 = vmax.f32 %v610_v12, 0.0  ;;  %v478_v22 = vmul.f32 %v1876_v13, %v2554_v0  ;;  %v1880_v23 = vunpack.c.h.bf16 %v2389_v4  ;;  %v2396_v10 = vld [vmem:[%s2549_s18 + $0xe0] sm:$0xff]  }
  0x3d   : > { %2448 = vst [vmem:[%s2588_s25 + $0x88] sm:$0xff] %v2137_v15   ;;  %v739_v24 = vmax.f32 %v611_v16, 0.0  ;;  %v612_v25 = vadd.f32 %v2563_v9, %v477_v17  ;;  %v479_v26 = vmul.f32 %v1879_v18, %v2554_v0  ;;  %v1883_v27 = vunpack.c.l.bf16 %v2390_v14 }
  0x3e   : > { %2449 = vst [vmem:[%s2588_s25 + $0x90] sm:$0xff] %v2142_v20   ;;  %v613_v28 = vadd.f32 %v2563_v9, %v478_v22  ;;  %v480_v29 = vmul.f32 %v1880_v23, %v2554_v0  ;;  %v1884_v30 = vunpack.c.h.bf16 %v2390_v14  ;;  %v1887_v31 = vunpack.c.l.bf16 %v2391_v19  ;;  %v2397_v23 = vld [vmem:[%s2549_s18 + $0xe8] sm:$0xff]  }
  0x3f   : > { %v2147_v33 = vpack.c.bf16 %v739_v24, %v738_v21  ;;  %v740_v34 = vmax.f32 %v612_v25, 0.0  ;;  %v614_v35 = vadd.f32 %v2563_v9, %v479_v26  ;;  %v481_v36 = vmul.f32 %v1883_v27, %v2554_v0 }
  0x40   : > { %v741_v37 = vmax.f32 %v613_v28, 0.0  ;;  %v615_v38 = vadd.f32 %v2563_v9, %v480_v29  ;;  %v482_v39 = vmul.f32 %v1884_v30, %v2554_v0  ;;  %v1888_v40 = vunpack.c.h.bf16 %v2391_v19 }
  0x41   : > { %2450 = vst [vmem:[%s2588_s25 + $0x98] sm:$0xff] %v2147_v33   ;;  %v742_v41 = vmax.f32 %v614_v35, 0.0  ;;  %v616_v42 = vadd.f32 %v2563_v9, %v481_v36  ;;  %v483_v43 = vmul.f32 %v1887_v31, %v2554_v0  ;;  %v1891_v44 = vunpack.c.l.bf16 %v2392_v32 }
  0x42   : > { %v2152_v46 = vpack.c.bf16 %v741_v37, %v740_v34  ;;  %v743_v47 = vmax.f32 %v615_v38, 0.0  ;;  %v617_v48 = vadd.f32 %v2563_v9, %v482_v39  ;;  %v484_v49 = vmul.f32 %v1888_v40, %v2554_v0 }
  0x43   : > { %v744_v50 = vmax.f32 %v616_v42, 0.0  ;;  %v618_v51 = vadd.f32 %v2563_v9, %v483_v43  ;;  %v1892_v52 = vunpack.c.h.bf16 %v2392_v32  ;;  %v485_v53 = vmul.f32 %v1891_v44, %v2554_v0  ;;  %v2398_v32 = vld [vmem:[%s2549_s18 + $0xf0] sm:$0xff]  }
  0x44   : > { %2451 = vst [vmem:[%s2588_s25 + $0xa0] sm:$0xff] %v2152_v46   ;;  %v2157_v55 = vpack.c.bf16 %v743_v47, %v742_v41  ;;  %v745_v56 = vmax.f32 %v617_v48, 0.0  ;;  %v619_v57 = vadd.f32 %v2563_v9, %v484_v49  ;;  %v1895_v58 = vunpack.c.l.bf16 %v2393_v45  ;;  %v2399_v41 = vld [vmem:[%s2549_s18 + $0xf8] sm:$0xff]  }
  0x45   : > { %v746_v59 = vmax.f32 %v618_v51, 0.0  ;;  %v486_v60 = vmul.f32 %v1892_v52, %v2554_v0  ;;  %v620_v61 = vadd.f32 %v2563_v9, %v485_v53  ;;  %v1896_v62 = vunpack.c.h.bf16 %v2393_v45 }
  0x46   : > { %2452 = vst [vmem:[%s2588_s25 + $0xa8] sm:$0xff] %v2157_v55   ;;  %v2162_v1 = vpack.c.bf16 %v745_v56, %v744_v50  ;;  %v747_v2 = vmax.f32 %v619_v57, 0.0  ;;  %v487_v3 = vmul.f32 %v1895_v58, %v2554_v0  ;;  %v1899_v4 = vunpack.c.l.bf16 %v2394_v54  ;;  %v2400_v50 = vld [vmem:[%s2549_s18 + $0x100] sm:$0xff]  }
  0x47   : > { %v621_v5 = vadd.f32 %v2563_v9, %v486_v60  ;;  %v748_v6 = vmax.f32 %v620_v61, 0.0  ;;  %v488_v7 = vmul.f32 %v1896_v62, %v2554_v0  ;;  %v1900_v8 = vunpack.c.h.bf16 %v2394_v54 }
  0x48   : > { %2453 = vst [vmem:[%s2588_s25 + $0xb0] sm:$0xff] %v2162_v1   ;;  %v2167_v11 = vpack.c.bf16 %v747_v2, %v746_v59  ;;  %v622_v12 = vadd.f32 %v2563_v9, %v487_v3  ;;  %v489_v13 = vmul.f32 %v1899_v4, %v2554_v0  ;;  %v1903_v14 = vunpack.c.l.bf16 %v2395_v63 }
  0x49   : > { %v749_v15 = vmax.f32 %v621_v5, 0.0  ;;  %v623_v16 = vadd.f32 %v2563_v9, %v488_v7  ;;  %v490_v17 = vmul.f32 %v1900_v8, %v2554_v0  ;;  %v1904_v18 = vunpack.c.h.bf16 %v2395_v63  ;;  %v2401_v63 = vld [vmem:[%s2549_s18 + $0x108] sm:$0xff]  }
  0x4a   : > { %2454 = vst [vmem:[%s2588_s25 + $0xb8] sm:$0xff] %v2167_v11   ;;  %v750_v19 = vmax.f32 %v622_v12, 0.0  ;;  %v624_v20 = vadd.f32 %v2563_v9, %v489_v13  ;;  %v491_v21 = vmul.f32 %v1903_v14, %v2554_v0  ;;  %v1907_v22 = vunpack.c.l.bf16 %v2396_v10 }
  0x4b   : > { %v2172_v24 = vpack.c.bf16 %v749_v15, %v748_v6  ;;  %v751_v25 = vmax.f32 %v623_v16, 0.0  ;;  %v625_v26 = vadd.f32 %v2563_v9, %v490_v17  ;;  %v492_v27 = vmul.f32 %v1904_v18, %v2554_v0 }
  0x4c   : > { %v752_v28 = vmax.f32 %v624_v20, 0.0  ;;  %v626_v29 = vadd.f32 %v2563_v9, %v491_v21  ;;  %v1908_v30 = vunpack.c.h.bf16 %v2396_v10  ;;  %v493_v31 = vmul.f32 %v1907_v22, %v2554_v0  ;;  %v2402_v10 = vld [vmem:[%s2549_s18 + $0x110] sm:$0xff]  }
  0x4d   : > { %2455 = vst [vmem:[%s2588_s25 + $0xc0] sm:$0xff] %v2172_v24   ;;  %v2177_v33 = vpack.c.bf16 %v751_v25, %v750_v19  ;;  %v753_v34 = vmax.f32 %v625_v26, 0.0  ;;  %v627_v35 = vadd.f32 %v2563_v9, %v492_v27  ;;  %v1911_v36 = vunpack.c.l.bf16 %v2397_v23  ;;  %v2403_v19 = vld [vmem:[%s2549_s18 + $0x118] sm:$0xff]  }
  0x4e   : > { %v754_v37 = vmax.f32 %v626_v29, 0.0  ;;  %v494_v38 = vmul.f32 %v1908_v30, %v2554_v0  ;;  %v628_v39 = vadd.f32 %v2563_v9, %v493_v31  ;;  %v1912_v40 = vunpack.c.h.bf16 %v2397_v23 }
  0x4f   : > { %2456 = vst [vmem:[%s2588_s25 + $0xc8] sm:$0xff] %v2177_v33   ;;  %v2182_v42 = vpack.c.bf16 %v753_v34, %v752_v28  ;;  %v755_v43 = vmax.f32 %v627_v35, 0.0  ;;  %v495_v44 = vmul.f32 %v1911_v36, %v2554_v0  ;;  %v1915_v45 = vunpack.c.l.bf16 %v2398_v32  ;;  %v2404_v28 = vld [vmem:[%s2549_s18 + $0x120] sm:$0xff]  }
  0x50   : > { %v629_v46 = vadd.f32 %v2563_v9, %v494_v38  ;;  %v756_v47 = vmax.f32 %v628_v39, 0.0  ;;  %v496_v48 = vmul.f32 %v1912_v40, %v2554_v0  ;;  %v1916_v49 = vunpack.c.h.bf16 %v2398_v32 }
  0x51   : > { %2457 = vst [vmem:[%s2588_s25 + $0xd0] sm:$0xff] %v2182_v42   ;;  %v2187_v51 = vpack.c.bf16 %v755_v43, %v754_v37  ;;  %v630_v52 = vadd.f32 %v2563_v9, %v495_v44  ;;  %v497_v53 = vmul.f32 %v1915_v45, %v2554_v0  ;;  %v1919_v54 = vunpack.c.l.bf16 %v2399_v41 }
  0x52   : > { %v757_v55 = vmax.f32 %v629_v46, 0.0  ;;  %v631_v56 = vadd.f32 %v2563_v9, %v496_v48  ;;  %v498_v57 = vmul.f32 %v1916_v49, %v2554_v0  ;;  %v1920_v58 = vunpack.c.h.bf16 %v2399_v41  ;;  %v2405_v41 = vld [vmem:[%s2549_s18 + $0x128] sm:$0xff]  }
  0x53   : > { %2458 = vst [vmem:[%s2588_s25 + $0xd8] sm:$0xff] %v2187_v51   ;;  %v758_v59 = vmax.f32 %v630_v52, 0.0  ;;  %v632_v60 = vadd.f32 %v2563_v9, %v497_v53  ;;  %v499_v61 = vmul.f32 %v1919_v54, %v2554_v0  ;;  %v1923_v62 = vunpack.c.l.bf16 %v2400_v50 }
  0x54   : > { %v2192_v1 = vpack.c.bf16 %v757_v55, %v756_v47  ;;  %v759_v2 = vmax.f32 %v631_v56, 0.0  ;;  %v633_v3 = vadd.f32 %v2563_v9, %v498_v57  ;;  %v500_v4 = vmul.f32 %v1920_v58, %v2554_v0 }
  0x55   : > { %v760_v5 = vmax.f32 %v632_v60, 0.0  ;;  %v634_v6 = vadd.f32 %v2563_v9, %v499_v61  ;;  %v1924_v7 = vunpack.c.h.bf16 %v2400_v50  ;;  %v501_v8 = vmul.f32 %v1923_v62, %v2554_v0  ;;  %v2406_v50 = vld [vmem:[%s2549_s18 + $0x130] sm:$0xff]  }
  0x56   : > { %2459 = vst [vmem:[%s2588_s25 + $0xe0] sm:$0xff] %v2192_v1   ;;  %v2197_v11 = vpack.c.bf16 %v759_v2, %v758_v59  ;;  %v761_v12 = vmax.f32 %v633_v3, 0.0  ;;  %v635_v13 = vadd.f32 %v2563_v9, %v500_v4  ;;  %v1927_v14 = vunpack.c.l.bf16 %v2401_v63  ;;  %v2407_v59 = vld [vmem:[%s2549_s18 + $0x138] sm:$0xff]  }
  0x57   : > { %v762_v15 = vmax.f32 %v634_v6, 0.0  ;;  %v502_v16 = vmul.f32 %v1924_v7, %v2554_v0  ;;  %v636_v17 = vadd.f32 %v2563_v9, %v501_v8  ;;  %v1928_v18 = vunpack.c.h.bf16 %v2401_v63 }
  0x58   : > { %2460 = vst [vmem:[%s2588_s25 + $0xe8] sm:$0xff] %v2197_v11   ;;  %v2202_v20 = vpack.c.bf16 %v761_v12, %v760_v5  ;;  %v763_v21 = vmax.f32 %v635_v13, 0.0  ;;  %v503_v22 = vmul.f32 %v1927_v14, %v2554_v0  ;;  %v1931_v23 = vunpack.c.l.bf16 %v2402_v10  ;;  %v2408_v5 = vld [vmem:[%s2549_s18 + $0x140] sm:$0xff]  }
  0x59   : > { %v637_v24 = vadd.f32 %v2563_v9, %v502_v16  ;;  %v764_v25 = vmax.f32 %v636_v17, 0.0  ;;  %v504_v26 = vmul.f32 %v1928_v18, %v2554_v0  ;;  %v1932_v27 = vunpack.c.h.bf16 %v2402_v10 }
  0x5a   : > { %2461 = vst [vmem:[%s2588_s25 + $0xf0] sm:$0xff] %v2202_v20   ;;  %v2207_v29 = vpack.c.bf16 %v763_v21, %v762_v15  ;;  %v638_v30 = vadd.f32 %v2563_v9, %v503_v22  ;;  %v505_v31 = vmul.f32 %v1931_v23, %v2554_v0  ;;  %v1935_v32 = vunpack.c.l.bf16 %v2403_v19 }
  0x5b   : > { %v765_v33 = vmax.f32 %v637_v24, 0.0  ;;  %v639_v34 = vadd.f32 %v2563_v9, %v504_v26  ;;  %v506_v35 = vmul.f32 %v1932_v27, %v2554_v0  ;;  %v1936_v36 = vunpack.c.h.bf16 %v2403_v19  ;;  %v2409_v19 = vld [vmem:[%s2549_s18 + $0x148] sm:$0xff]  }
  0x5c   : > { %2462 = vst [vmem:[%s2588_s25 + $0xf8] sm:$0xff] %v2207_v29   ;;  %v766_v37 = vmax.f32 %v638_v30, 0.0  ;;  %v640_v38 = vadd.f32 %v2563_v9, %v505_v31  ;;  %v507_v39 = vmul.f32 %v1935_v32, %v2554_v0  ;;  %v1939_v40 = vunpack.c.l.bf16 %v2404_v28 }
  0x5d   : > { %v2212_v42 = vpack.c.bf16 %v765_v33, %v764_v25  ;;  %v767_v43 = vmax.f32 %v639_v34, 0.0  ;;  %v641_v44 = vadd.f32 %v2563_v9, %v506_v35  ;;  %v508_v45 = vmul.f32 %v1936_v36, %v2554_v0 }
  0x5e   : > { %v768_v46 = vmax.f32 %v640_v38, 0.0  ;;  %v642_v47 = vadd.f32 %v2563_v9, %v507_v39  ;;  %v1940_v48 = vunpack.c.h.bf16 %v2404_v28  ;;  %v509_v49 = vmul.f32 %v1939_v40, %v2554_v0  ;;  %v2410_v28 = vld [vmem:[%s2549_s18 + $0x150] sm:$0xff]  }
  0x5f   : > { %2463 = vst [vmem:[%s2588_s25 + $0x100] sm:$0xff] %v2212_v42   ;;  %v2217_v51 = vpack.c.bf16 %v767_v43, %v766_v37  ;;  %v769_v52 = vmax.f32 %v641_v44, 0.0  ;;  %v643_v53 = vadd.f32 %v2563_v9, %v508_v45  ;;  %v1943_v54 = vunpack.c.l.bf16 %v2405_v41  ;;  %v2411_v37 = vld [vmem:[%s2549_s18 + $0x158] sm:$0xff]  }
  0x60   : > { %v770_v55 = vmax.f32 %v642_v47, 0.0  ;;  %v510_v56 = vmul.f32 %v1940_v48, %v2554_v0  ;;  %v644_v57 = vadd.f32 %v2563_v9, %v509_v49  ;;  %v1944_v58 = vunpack.c.h.bf16 %v2405_v41 }
  0x61   : > { %2464 = vst [vmem:[%s2588_s25 + $0x108] sm:$0xff] %v2217_v51   ;;  %v2222_v60 = vpack.c.bf16 %v769_v52, %v768_v46  ;;  %v771_v61 = vmax.f32 %v643_v53, 0.0  ;;  %v511_v62 = vmul.f32 %v1943_v54, %v2554_v0  ;;  %v1947_v63 = vunpack.c.l.bf16 %v2406_v50  ;;  %v2412_v46 = vld [vmem:[%s2549_s18 + $0x160] sm:$0xff]  }
  0x62   : > { %v645_v1 = vadd.f32 %v2563_v9, %v510_v56  ;;  %v772_v2 = vmax.f32 %v644_v57, 0.0  ;;  %v512_v3 = vmul.f32 %v1944_v58, %v2554_v0  ;;  %v1948_v4 = vunpack.c.h.bf16 %v2406_v50 }
  0x63   : > { %2465 = vst [vmem:[%s2588_s25 + $0x110] sm:$0xff] %v2222_v60   ;;  %v2227_v6 = vpack.c.bf16 %v771_v61, %v770_v55  ;;  %v646_v7 = vadd.f32 %v2563_v9, %v511_v62  ;;  %v513_v8 = vmul.f32 %v1947_v63, %v2554_v0  ;;  %v1951_v10 = vunpack.c.l.bf16 %v2407_v59 }
  0x64   : > { %v773_v11 = vmax.f32 %v645_v1, 0.0  ;;  %v647_v12 = vadd.f32 %v2563_v9, %v512_v3  ;;  %v514_v13 = vmul.f32 %v1948_v4, %v2554_v0  ;;  %v1952_v14 = vunpack.c.h.bf16 %v2407_v59  ;;  %v2413_v59 = vld [vmem:[%s2549_s18 + $0x168] sm:$0xff]  }
  0x65   : > { %2466 = vst [vmem:[%s2588_s25 + $0x118] sm:$0xff] %v2227_v6   ;;  %v774_v15 = vmax.f32 %v646_v7, 0.0  ;;  %v648_v16 = vadd.f32 %v2563_v9, %v513_v8  ;;  %v515_v17 = vmul.f32 %v1951_v10, %v2554_v0  ;;  %v1955_v18 = vunpack.c.l.bf16 %v2408_v5 }
  0x66   : > { %v2232_v20 = vpack.c.bf16 %v773_v11, %v772_v2  ;;  %v775_v21 = vmax.f32 %v647_v12, 0.0  ;;  %v649_v22 = vadd.f32 %v2563_v9, %v514_v13  ;;  %v516_v23 = vmul.f32 %v1952_v14, %v2554_v0 }
  0x67   : > { %v776_v24 = vmax.f32 %v648_v16, 0.0  ;;  %v650_v25 = vadd.f32 %v2563_v9, %v515_v17  ;;  %v1956_v26 = vunpack.c.h.bf16 %v2408_v5  ;;  %v517_v27 = vmul.f32 %v1955_v18, %v2554_v0  ;;  %v2414_v5 = vld [vmem:[%s2549_s18 + $0x170] sm:$0xff]  }
  0x68   : > { %2467 = vst [vmem:[%s2588_s25 + $0x120] sm:$0xff] %v2232_v20   ;;  %v2237_v29 = vpack.c.bf16 %v775_v21, %v774_v15  ;;  %v777_v30 = vmax.f32 %v649_v22, 0.0  ;;  %v651_v31 = vadd.f32 %v2563_v9, %v516_v23  ;;  %v1959_v32 = vunpack.c.l.bf16 %v2409_v19  ;;  %v2415_v15 = vld [vmem:[%s2549_s18 + $0x178] sm:$0xff]  }
  0x69   : > { %v778_v33 = vmax.f32 %v650_v25, 0.0  ;;  %v518_v34 = vmul.f32 %v1956_v26, %v2554_v0  ;;  %v652_v35 = vadd.f32 %v2563_v9, %v517_v27  ;;  %v1960_v36 = vunpack.c.h.bf16 %v2409_v19 }
  0x6a   : > { %2468 = vst [vmem:[%s2588_s25 + $0x128] sm:$0xff] %v2237_v29   ;;  %v2242_v38 = vpack.c.bf16 %v777_v30, %v776_v24  ;;  %v779_v39 = vmax.f32 %v651_v31, 0.0  ;;  %v519_v40 = vmul.f32 %v1959_v32, %v2554_v0  ;;  %v1963_v41 = vunpack.c.l.bf16 %v2410_v28  ;;  %v2416_v24 = vld [vmem:[%s2549_s18 + $0x180] sm:$0xff]  }
  0x6b   : > { %v653_v42 = vadd.f32 %v2563_v9, %v518_v34  ;;  %v780_v43 = vmax.f32 %v652_v35, 0.0  ;;  %v520_v44 = vmul.f32 %v1960_v36, %v2554_v0  ;;  %v1964_v45 = vunpack.c.h.bf16 %v2410_v28  ;;  %v2851_v35 = vld [vmem:[%s2966_s1] ss:$0 sm:$0xff] }
  0x6c   : > { %2469 = vst [vmem:[%s2588_s25 + $0x130] sm:$0xff] %v2242_v38   ;;  %v2247_v47 = vpack.c.bf16 %v779_v39, %v778_v33  ;;  %v654_v48 = vadd.f32 %v2563_v9, %v519_v40  ;;  %v521_v49 = vmul.f32 %v1963_v41, %v2554_v0  ;;  %v1967_v50 = vunpack.c.l.bf16 %v2411_v37  ;;  %v2417_v38 = vld [vmem:[%s2549_s18 + $0x188] sm:$0xff]  }
  0x6d   : > { %v781_v51 = vmax.f32 %v653_v42, 0.0  ;;  %v655_v52 = vadd.f32 %v2563_v9, %v520_v44  ;;  %v522_v53 = vmul.f32 %v1964_v45, %v2554_v0  ;;  %v1968_v54 = vunpack.c.h.bf16 %v2411_v37 }
  0x6e   : > { %2470 = vst [vmem:[%s2588_s25 + $0x138] sm:$0xff] %v2247_v47   ;;  %v782_v55 = vmax.f32 %v654_v48, 0.0  ;;  %v656_v56 = vadd.f32 %v2563_v9, %v521_v49  ;;  %v523_v57 = vmul.f32 %v1967_v50, %v2554_v0  ;;  %v1971_v58 = vunpack.c.l.bf16 %v2412_v46  ;;  %v2418_v47 = vld [vmem:[%s2549_s18 + $0x190] sm:$0xff]  }
  0x6f   : > { %v2252_v60 = vpack.c.bf16 %v781_v51, %v780_v43  ;;  %v783_v61 = vmax.f32 %v655_v52, 0.0  ;;  %v657_v62 = vadd.f32 %v2563_v9, %v522_v53  ;;  %v524_v63 = vmul.f32 %v1968_v54, %v2554_v0  ;;  %v2860_v43 = vld [vmem:[%s2967_s2] ss:$0 sm:$0xff] }
  0x70   : > { %v784_v1 = vmax.f32 %v656_v56, 0.0  ;;  %v658_v2 = vadd.f32 %v2563_v9, %v523_v57  ;;  %v1972_v3 = vunpack.c.h.bf16 %v2412_v46  ;;  %v525_v4 = vmul.f32 %v1971_v58, %v2554_v0 }
  0x71   : > { %2471 = vst [vmem:[%s2588_s25 + $0x140] sm:$0xff] %v2252_v60   ;;  %v2257_v6 = vpack.c.bf16 %v783_v61, %v782_v55  ;;  %v785_v7 = vmax.f32 %v657_v62, 0.0  ;;  %v659_v8 = vadd.f32 %v2563_v9, %v524_v63  ;;  %v1975_v10 = vunpack.c.l.bf16 %v2413_v59  ;;  %v2419_v55 = vld [vmem:[%s2549_s18 + $0x198] sm:$0xff]  }
  0x72   : > { %v786_v11 = vmax.f32 %v658_v2, 0.0  ;;  %v526_v12 = vmul.f32 %v1972_v3, %v2554_v0  ;;  %v660_v13 = vadd.f32 %v2563_v9, %v525_v4  ;;  %v1976_v14 = vunpack.c.h.bf16 %v2413_v59 }
  0x73   : > { %2472 = vst [vmem:[%s2588_s25 + $0x148] sm:$0xff] %v2257_v6   ;;  %v2262_v16 = vpack.c.bf16 %v785_v7, %v784_v1  ;;  %v787_v17 = vmax.f32 %v659_v8, 0.0  ;;  %v527_v18 = vmul.f32 %v1975_v10, %v2554_v0  ;;  %v1979_v19 = vunpack.c.l.bf16 %v2414_v5  ;;  %v2420_v1 = vld [vmem:[%s2549_s18 + $0x1a0] sm:$0xff]  }
  0x74   : > { %v661_v20 = vadd.f32 %v2563_v9, %v526_v12  ;;  %v788_v21 = vmax.f32 %v660_v13, 0.0  ;;  %v528_v22 = vmul.f32 %v1976_v14, %v2554_v0  ;;  %v1980_v23 = vunpack.c.h.bf16 %v2414_v5 }
  0x75   : > { %2473 = vst [vmem:[%s2588_s25 + $0x150] sm:$0xff] %v2262_v16   ;;  %v2267_v25 = vpack.c.bf16 %v787_v17, %v786_v11  ;;  %v662_v26 = vadd.f32 %v2563_v9, %v527_v18  ;;  %v529_v27 = vmul.f32 %v1979_v19, %v2554_v0  ;;  %v1983_v28 = vunpack.c.l.bf16 %v2415_v15 }
  0x76   : > { %v789_v29 = vmax.f32 %v661_v20, 0.0  ;;  %v663_v30 = vadd.f32 %v2563_v9, %v528_v22  ;;  %v530_v31 = vmul.f32 %v1980_v23, %v2554_v0  ;;  %v1984_v32 = vunpack.c.h.bf16 %v2415_v15  ;;  %v2421_v15 = vld [vmem:[%s2549_s18 + $0x1a8] sm:$0xff]  }
  0x77   : > { %2474 = vst [vmem:[%s2588_s25 + $0x158] sm:$0xff] %v2267_v25   ;;  %v790_v33 = vmax.f32 %v662_v26, 0.0  ;;  %v664_v34 = vadd.f32 %v2563_v9, %v529_v27  ;;  %v531_v36 = vmul.f32 %v2851_v35, %v1983_v28  ;;  %v1987_v37 = vunpack.c.l.bf16 %v2416_v24 }
  0x78   : > { %v2272_v39 = vpack.c.bf16 %v789_v29, %v788_v21  ;;  %v791_v40 = vmax.f32 %v663_v30, 0.0  ;;  %v665_v0 = vadd.f32 %v2563_v9, %v530_v31  ;;  %v532_v41 = vmul.f32 %v2851_v35, %v1984_v32 }
  0x79   : > { %v792_v42 = vmax.f32 %v664_v34, 0.0  ;;  %v666_v44 = vadd.f32 %v2860_v43, %v531_v36  ;;  %v1988_v45 = vunpack.c.h.bf16 %v2416_v24  ;;  %v533_v46 = vmul.f32 %v2851_v35, %v1987_v37  ;;  %v2422_v24 = vld [vmem:[%s2549_s18 + $0x1b0] sm:$0xff]  }
  0x7a   : > { %2475 = vst [vmem:[%s2588_s25 + $0x160] sm:$0xff] %v2272_v39   ;;  %v2277_v48 = vpack.c.bf16 %v791_v40, %v790_v33  ;;  %v793_v49 = vmax.f32 %v665_v0, 0.0  ;;  %v667_v9 = vadd.f32 %v2860_v43, %v532_v41  ;;  %v1991_v50 = vunpack.c.l.bf16 %v2417_v38  ;;  %v2423_v33 = vld [vmem:[%s2549_s18 + $0x1b8] sm:$0xff]  }
  0x7b   : > { %v794_v51 = vmax.f32 %v666_v44, 0.0  ;;  %v534_v52 = vmul.f32 %v2851_v35, %v1988_v45  ;;  %v668_v53 = vadd.f32 %v2860_v43, %v533_v46  ;;  %v1992_v54 = vunpack.c.h.bf16 %v2417_v38 }
  0x7c   : > { %2476 = vst [vmem:[%s2588_s25 + $0x168] sm:$0xff] %v2277_v48   ;;  %v2282_v56 = vpack.c.bf16 %v793_v49, %v792_v42  ;;  %v795_v57 = vmax.f32 %v667_v9, 0.0  ;;  %v535_v58 = vmul.f32 %v2851_v35, %v1991_v50  ;;  %v1995_v59 = vunpack.c.l.bf16 %v2418_v47  ;;  %v2424_v42 = vld [vmem:[%s2549_s18 + $0x1c0] sm:$0xff]  }
  0x7d   : > { %v669_v60 = vadd.f32 %v2860_v43, %v534_v52  ;;  %v796_v61 = vmax.f32 %v668_v53, 0.0  ;;  %v536_v62 = vmul.f32 %v2851_v35, %v1992_v54  ;;  %v1996_v63 = vunpack.c.h.bf16 %v2418_v47 }
  0x7e   : > { %2477 = vst [vmem:[%s2588_s25 + $0x170] sm:$0xff] %v2282_v56   ;;  %v2287_v2 = vpack.c.bf16 %v795_v57, %v794_v51  ;;  %v670_v3 = vadd.f32 %v2860_v43, %v535_v58  ;;  %v537_v4 = vmul.f32 %v2851_v35, %v1995_v59  ;;  %v1999_v5 = vunpack.c.l.bf16 %v2419_v55 }
  0x7f   : > { %v797_v6 = vmax.f32 %v669_v60, 0.0  ;;  %v671_v7 = vadd.f32 %v2860_v43, %v536_v62  ;;  %v538_v8 = vmul.f32 %v2851_v35, %v1996_v63  ;;  %v2000_v10 = vunpack.c.h.bf16 %v2419_v55  ;;  %v2425_v55 = vld [vmem:[%s2549_s18 + $0x1c8] sm:$0xff]  }
  0x80   : > { %2478 = vst [vmem:[%s2588_s25 + $0x178] sm:$0xff] %v2287_v2   ;;  %v798_v11 = vmax.f32 %v670_v3, 0.0  ;;  %v672_v12 = vadd.f32 %v2860_v43, %v537_v4  ;;  %v539_v13 = vmul.f32 %v2851_v35, %v1999_v5  ;;  %v2003_v14 = vunpack.c.l.bf16 %v2420_v1 }
  0x81   : > { %v2292_v16 = vpack.c.bf16 %v797_v6, %v796_v61  ;;  %v799_v17 = vmax.f32 %v671_v7, 0.0  ;;  %v673_v18 = vadd.f32 %v2860_v43, %v538_v8  ;;  %v540_v19 = vmul.f32 %v2851_v35, %v2000_v10 }
  0x82   : > { %v800_v20 = vmax.f32 %v672_v12, 0.0  ;;  %v674_v21 = vadd.f32 %v2860_v43, %v539_v13  ;;  %v2004_v22 = vunpack.c.h.bf16 %v2420_v1  ;;  %v541_v23 = vmul.f32 %v2851_v35, %v2003_v14  ;;  %v2426_v1 = vld [vmem:[%s2549_s18 + $0x1d0] sm:$0xff]  }
  0x83   : > { %2479 = vst [vmem:[%s2588_s25 + $0x180] sm:$0xff] %v2292_v16   ;;  %v2297_v25 = vpack.c.bf16 %v799_v17, %v798_v11  ;;  %v801_v26 = vmax.f32 %v673_v18, 0.0  ;;  %v675_v27 = vadd.f32 %v2860_v43, %v540_v19  ;;  %v2007_v28 = vunpack.c.l.bf16 %v2421_v15  ;;  %v2427_v11 = vld [vmem:[%s2549_s18 + $0x1d8] sm:$0xff]  }
  0x84   : > { %v802_v29 = vmax.f32 %v674_v21, 0.0  ;;  %v542_v30 = vmul.f32 %v2851_v35, %v2004_v22  ;;  %v676_v31 = vadd.f32 %v2860_v43, %v541_v23  ;;  %v2008_v32 = vunpack.c.h.bf16 %v2421_v15 }
  0x85   : > { %2480 = vst [vmem:[%s2588_s25 + $0x188] sm:$0xff] %v2297_v25   ;;  %v2302_v34 = vpack.c.bf16 %v801_v26, %v800_v20  ;;  %v803_v36 = vmax.f32 %v675_v27, 0.0  ;;  %v543_v37 = vmul.f32 %v2851_v35, %v2007_v28  ;;  %v2011_v38 = vunpack.c.l.bf16 %v2422_v24  ;;  %v2428_v20 = vld [vmem:[%s2549_s18 + $0x1e0] sm:$0xff]  }
  0x86   : > { %v677_v39 = vadd.f32 %v2860_v43, %v542_v30  ;;  %v804_v40 = vmax.f32 %v676_v31, 0.0  ;;  %v544_v0 = vmul.f32 %v2851_v35, %v2008_v32  ;;  %v2012_v41 = vunpack.c.h.bf16 %v2422_v24 }
  0x87   : > { %2481 = vst [vmem:[%s2588_s25 + $0x190] sm:$0xff] %v2302_v34   ;;  %v2307_v44 = vpack.c.bf16 %v803_v36, %v802_v29  ;;  %v678_v45 = vadd.f32 %v2860_v43, %v543_v37  ;;  %v545_v46 = vmul.f32 %v2851_v35, %v2011_v38  ;;  %v2015_v47 = vunpack.c.l.bf16 %v2423_v33 }
  0x88   : > { %v805_v48 = vmax.f32 %v677_v39, 0.0  ;;  %v679_v49 = vadd.f32 %v2860_v43, %v544_v0  ;;  %v546_v9 = vmul.f32 %v2851_v35, %v2012_v41  ;;  %v2016_v50 = vunpack.c.h.bf16 %v2423_v33  ;;  %v2429_v33 = vld [vmem:[%s2549_s18 + $0x1e8] sm:$0xff]  }
  0x89   : > { %2482 = vst [vmem:[%s2588_s25 + $0x198] sm:$0xff] %v2307_v44   ;;  %v806_v51 = vmax.f32 %v678_v45, 0.0  ;;  %v680_v52 = vadd.f32 %v2860_v43, %v545_v46  ;;  %v547_v53 = vmul.f32 %v2851_v35, %v2015_v47  ;;  %v2019_v54 = vunpack.c.l.bf16 %v2424_v42 }
  0x8a   : > { %v2312_v56 = vpack.c.bf16 %v805_v48, %v804_v40  ;;  %v807_v57 = vmax.f32 %v679_v49, 0.0  ;;  %v681_v58 = vadd.f32 %v2860_v43, %v546_v9  ;;  %v548_v59 = vmul.f32 %v2851_v35, %v2016_v50 }
  0x8b   : > { %v808_v60 = vmax.f32 %v680_v52, 0.0  ;;  %v682_v61 = vadd.f32 %v2860_v43, %v547_v53  ;;  %v2020_v62 = vunpack.c.h.bf16 %v2424_v42  ;;  %v549_v63 = vmul.f32 %v2851_v35, %v2019_v54  ;;  %v2430_v42 = vld [vmem:[%s2549_s18 + $0x1f0] sm:$0xff]  }
  0x8c   : > { %2483 = vst [vmem:[%s2588_s25 + $0x1a0] sm:$0xff] %v2312_v56   ;;  %v2317_v2 = vpack.c.bf16 %v807_v57, %v806_v51  ;;  %v809_v3 = vmax.f32 %v681_v58, 0.0  ;;  %v683_v4 = vadd.f32 %v2860_v43, %v548_v59  ;;  %v2023_v5 = vunpack.c.l.bf16 %v2425_v55  ;;  %v2431_v51 = vld [vmem:[%s2549_s18 + $0x1f8] sm:$0xff]  }
  0x8d   : > { %v810_v6 = vmax.f32 %v682_v61, 0.0  ;;  %v550_v7 = vmul.f32 %v2851_v35, %v2020_v62  ;;  %v684_v8 = vadd.f32 %v2860_v43, %v549_v63  ;;  %v2024_v10 = vunpack.c.h.bf16 %v2425_v55 }
  0x8e   : > { %2484 = vst [vmem:[%s2588_s25 + $0x1a8] sm:$0xff] %v2317_v2   ;;  %v2322_v12 = vpack.c.bf16 %v809_v3, %v808_v60  ;;  %v811_v13 = vmax.f32 %v683_v4, 0.0  ;;  %v551_v14 = vmul.f32 %v2851_v35, %v2023_v5  ;;  %v2027_v15 = vunpack.c.l.bf16 %v2426_v1 }
  0x8f   : > { %v685_v16 = vadd.f32 %v2860_v43, %v550_v7  ;;  %v812_v17 = vmax.f32 %v684_v8, 0.0  ;;  %v552_v18 = vmul.f32 %v2851_v35, %v2024_v10  ;;  %v2028_v19 = vunpack.c.h.bf16 %v2426_v1 }
  0x90   : > { %2485 = vst [vmem:[%s2588_s25 + $0x1b0] sm:$0xff] %v2322_v12   ;;  %v2327_v21 = vpack.c.bf16 %v811_v13, %v810_v6  ;;  %v686_v22 = vadd.f32 %v2860_v43, %v551_v14  ;;  %v553_v23 = vmul.f32 %v2851_v35, %v2027_v15  ;;  %v2031_v24 = vunpack.c.l.bf16 %v2427_v11 }
  0x91   : > { %v813_v25 = vmax.f32 %v685_v16, 0.0  ;;  %v687_v26 = vadd.f32 %v2860_v43, %v552_v18  ;;  %v554_v27 = vmul.f32 %v2851_v35, %v2028_v19  ;;  %v2032_v28 = vunpack.c.h.bf16 %v2427_v11 }
  0x92   : > { %2486 = vst [vmem:[%s2588_s25 + $0x1b8] sm:$0xff] %v2327_v21   ;;  %v814_v29 = vmax.f32 %v686_v22, 0.0  ;;  %v688_v30 = vadd.f32 %v2860_v43, %v553_v23  ;;  %v555_v31 = vmul.f32 %v2851_v35, %v2031_v24  ;;  %v2035_v32 = vunpack.c.l.bf16 %v2428_v20 }
  0x93   : > { %v2332_v34 = vpack.c.bf16 %v813_v25, %v812_v17  ;;  %v815_v36 = vmax.f32 %v687_v26, 0.0  ;;  %v689_v37 = vadd.f32 %v2860_v43, %v554_v27  ;;  %v556_v38 = vmul.f32 %v2851_v35, %v2032_v28 }
  0x94   : > { %v816_v39 = vmax.f32 %v688_v30, 0.0  ;;  %v690_v40 = vadd.f32 %v2860_v43, %v555_v31  ;;  %v2036_v0 = vunpack.c.h.bf16 %v2428_v20  ;;  %v557_v41 = vmul.f32 %v2851_v35, %v2035_v32 }
  0x95   : > { %2487 = vst [vmem:[%s2588_s25 + $0x1c0] sm:$0xff] %v2332_v34   ;;  %v2337_v44 = vpack.c.bf16 %v815_v36, %v814_v29  ;;  %v817_v45 = vmax.f32 %v689_v37, 0.0  ;;  %v691_v46 = vadd.f32 %v2860_v43, %v556_v38  ;;  %v2039_v47 = vunpack.c.l.bf16 %v2429_v33 }
  0x96   : > { %v818_v48 = vmax.f32 %v690_v40, 0.0  ;;  %v558_v49 = vmul.f32 %v2851_v35, %v2036_v0  ;;  %v692_v9 = vadd.f32 %v2860_v43, %v557_v41  ;;  %v2040_v50 = vunpack.c.h.bf16 %v2429_v33 }
  0x97   : > { %2488 = vst [vmem:[%s2588_s25 + $0x1c8] sm:$0xff] %v2337_v44   ;;  %v2342_v52 = vpack.c.bf16 %v817_v45, %v816_v39  ;;  %v819_v53 = vmax.f32 %v691_v46, 0.0  ;;  %v559_v54 = vmul.f32 %v2851_v35, %v2039_v47  ;;  %v2043_v55 = vunpack.c.l.bf16 %v2430_v42 }
  0x98   : > { %v693_v56 = vadd.f32 %v2860_v43, %v558_v49  ;;  %v820_v57 = vmax.f32 %v692_v9, 0.0  ;;  %v560_v58 = vmul.f32 %v2851_v35, %v2040_v50  ;;  %v2044_v59 = vunpack.c.h.bf16 %v2430_v42 }
  0x99   : > { %2489 = vst [vmem:[%s2588_s25 + $0x1d0] sm:$0xff] %v2342_v52   ;;  %v2347_v60 = vpack.c.bf16 %v819_v53, %v818_v48  ;;  %v694_v61 = vadd.f32 %v2860_v43, %v559_v54  ;;  %v561_v62 = vmul.f32 %v2851_v35, %v2043_v55  ;;  %v2047_v63 = vunpack.c.l.bf16 %v2431_v51 }
  0x9a   : > { %v821_v1 = vmax.f32 %v693_v56, 0.0  ;;  %v695_v2 = vadd.f32 %v2860_v43, %v560_v58  ;;  %v562_v3 = vmul.f32 %v2851_v35, %v2044_v59  ;;  %v2048_v4 = vunpack.c.h.bf16 %v2431_v51 }
  0x9b   : > { %2490 = vst [vmem:[%s2588_s25 + $0x1d8] sm:$0xff] %v2347_v60   ;;  %v822_v5 = vmax.f32 %v694_v61, 0.0  ;;  %v696_v6 = vadd.f32 %v2860_v43, %v561_v62  ;;  %v563_v7 = vmul.f32 %v2851_v35, %v2047_v63 }
  0x9c   : > { %v2352_v8 = vpack.c.bf16 %v821_v1, %v820_v57  ;;  %v823_v10 = vmax.f32 %v695_v2, 0.0  ;;  %v697_v11 = vadd.f32 %v2860_v43, %v562_v3  ;;  %v564_v12 = vmul.f32 %v2851_v35, %v2048_v4 }
  0x9d   : > { %v824_v13 = vmax.f32 %v696_v6, 0.0  ;;  %v698_v14 = vadd.f32 %v2860_v43, %v563_v7 }
  0x9e   : > { %2491 = vst [vmem:[%s2588_s25 + $0x1e0] sm:$0xff] %v2352_v8   ;;  %v2357_v15 = vpack.c.bf16 %v823_v10, %v822_v5  ;;  %v825_v16 = vmax.f32 %v697_v11, 0.0  ;;  %v699_v17 = vadd.f32 %v2860_v43, %v564_v12 }
  0x9f   : > { %v826_v18 = vmax.f32 %v698_v14, 0.0 }
  0xa0   : > { %2492 = vst [vmem:[%s2588_s25 + $0x1e8] sm:$0xff] %v2357_v15   ;;  %v2362_v19 = vpack.c.bf16 %v825_v16, %v824_v13  ;;  %v827_v20 = vmax.f32 %v699_v17, 0.0 }
  0xa2   : > { %2493 = vst [vmem:[%s2588_s25 + $0x1f0] sm:$0xff] %v2362_v19   ;;  %v2367_v21 = vpack.c.bf16 %v827_v20, %v826_v18 }
  0xa4   : > { %2494 = vst [vmem:[%s2588_s25 + $0x1f8] sm:$0xff] %v2367_v21  }
  0xa5 PF: > { %s13_s12 = sadd.s32 1, %s2511_s12  }
  0xa6   : > { %p10_p4 = scmp.ge.s32.totalorder %s13_s12, 4  }
  0xa8   :  { %12 = sbr.rel (!%p10_p4) target bundleno = 1 (0x1), region = 62 }

</bundles_post_ra>
